<compile_context>
chip_gen: v7x
topology: tpu7x:2x2x1
jax: 0.10.0
libtpu: 0.0.40
codegen_flags: <defaults>
</compile_context>

<pallas_src>
import math

import jax
import jax.numpy as jnp
from jax.experimental import pallas as pl
from jax.experimental.pallas import tpu as pltpu

# Small shapes consistent with the module (dim=32, heads=8 -> d=4, hidden=4*dim).
DIM = 32
HEADS = 8
D = DIM // HEADS            # 4
HIDDEN = 4 * DIM            # 128
B = 2
N = 8
NORM = float(D) ** 0.5
LN_EPS = 1e-5


def _gelu_tanh(x):
    # TODO(synk): PyTorch nn.GELU() defaults to the exact erf-based GELU; we use the
    #             tanh approximation for guaranteed Mosaic lowering (max diff ~1e-3).
    c = math.sqrt(2.0 / math.pi)
    return 0.5 * x * (1.0 + jnp.tanh(c * (x + 0.044715 * x * x * x)))


def _layer_norm(h, gamma, beta):
    mu = jnp.mean(h, axis=-1, keepdims=True)
    var = jnp.mean((h - mu) ** 2, axis=-1, keepdims=True)
    return (h - mu) * jax.lax.rsqrt(var + LN_EPS) * gamma + beta


def encoder_kernel(x_ref, wqkv_ref, bqkv_ref, wp_ref, w1_ref, b1_ref, w2_ref,
                   vec_ref, o_ref):
    # x_ref: (B, N, DIM); wqkv: (DIM, 3*DIM); bqkv: (1, 3*DIM); wp: (DIM, DIM)
    # w1: (DIM, HIDDEN); b1: (1, HIDDEN); w2: (HIDDEN, DIM)
    # vec_ref: (6, DIM) = [proj bias; ln1 gamma; ln1 beta; mlp bias2; ln2 gamma; ln2 beta]
    b, n, dim = x_ref.shape
    x = x_ref[...].astype(jnp.float32)                       # (B, N, DIM)
    x2 = x.reshape(b * n, dim)                               # (B*N, DIM)

    # Fused QKV projection for all heads: one (B*N, DIM) @ (DIM, 3*DIM) matmul.
    qkv = jnp.dot(x2, wqkv_ref[...], preferred_element_type=jnp.float32) + bqkv_ref[...]
    qkv = qkv.reshape(b, n, 3 * dim)                         # (B, N, 3*DIM)

    # Per-head attention, batched over B.  Head order matches torch.cat in the module.
    head_outs = []
    for h in range(HEADS):
        qh = qkv[:, :, h * D:(h + 1) * D]                            # (B, N, D)
        kh = qkv[:, :, dim + h * D:dim + (h + 1) * D]                # (B, N, D)
        vh = qkv[:, :, 2 * dim + h * D:2 * dim + (h + 1) * D]        # (B, N, D)

        s = jnp.einsum("bqd,bkd->bqk", qh, kh,
                       preferred_element_type=jnp.float32) * (1.0 / NORM)  # (B, Nq, Nk)
        # softmax over the QUERY axis (torch dim=1) -> axis=1 here (sublane reduction).
        s = s - jnp.max(s, axis=1, keepdims=True)
        p = jnp.exp(s)
        p = p * pl.reciprocal(jnp.sum(p, axis=1, keepdims=True), approx=True)
        # TODO(synk): Dropout(p=0.1) on the attention matrix is identity in eval mode;
        #             training mode would need pltpu.prng_seed + pltpu.stateful_bernoulli.
        head_outs.append(jnp.einsum("bqk,bkd->bqd", p, vh,
                                    preferred_element_type=jnp.float32))  # (B, N, D)

    attn = jnp.concatenate(head_outs, axis=-1).reshape(b * n, dim)   # (B*N, DIM)

    bp  = vec_ref[0:1, :]
    g1  = vec_ref[1:2, :]
    be1 = vec_ref[2:3, :]
    b2  = vec_ref[3:4, :]
    g2  = vec_ref[4:5, :]
    be2 = vec_ref[5:6, :]

    # Output projector + residual + LayerNorm1.
    proj = jnp.dot(attn, wp_ref[...], preferred_element_type=jnp.float32) + bp
    h1 = _layer_norm(x2 + proj, g1, be1)                     # (B*N, DIM)

    # MLP: Linear -> GELU -> Linear -> GELU, then residual + LayerNorm2.
    m = _gelu_tanh(jnp.dot(h1, w1_ref[...], preferred_element_type=jnp.float32) + b1_ref[...])
    m = _gelu_tanh(jnp.dot(m, w2_ref[...], preferred_element_type=jnp.float32) + b2)
    out = _layer_norm(h1 + m, g2, be2)

    o_ref[...] = out.reshape(b, n, dim).astype(o_ref.dtype)


@jax.jit
def encoder(x, wqkv, bqkv, wp, w1, b1, w2, vec):
    """Fused Encoder forward. x: (B, N, DIM) -> (B, N, DIM)."""
    vmem = lambda: pl.BlockSpec(memory_space=pltpu.MemorySpace.VMEM)
    return pl.pallas_call(
        encoder_kernel,
        out_shape=jax.ShapeDtypeStruct(x.shape, x.dtype),
        in_specs=[vmem() for _ in range(8)],
        out_specs=vmem(),
    )(x, wqkv, bqkv, wp, w1, b1, w2, vec)


def reference(x, wqkv, bqkv, wp, w1, b1, w2, vec):
    """Pure-JAX mirror of the PyTorch Encoder forward (same packed params)."""
    b, n, dim = x.shape
    x2 = x.reshape(b * n, dim)
    qkv = (x2 @ wqkv + bqkv).reshape(b, n, 3 * dim)
    outs = []
    for h in range(HEADS):
        qh = qkv[:, :, h * D:(h + 1) * D]
        kh = qkv[:, :, dim + h * D:dim + (h + 1) * D]
        vh = qkv[:, :, 2 * dim + h * D:2 * dim + (h + 1) * D]
        s = jnp.einsum("bqd,bkd->bqk", qh, kh) / NORM
        p = jax.nn.softmax(s, axis=1)      # softmax over query axis (torch dim=1)
        outs.append(jnp.einsum("bqk,bkd->bqd", p, vh))
    attn = jnp.concatenate(outs, axis=-1).reshape(b * n, dim)

    bp, g1, be1, b2, g2, be2 = (vec[i:i + 1, :] for i in range(6))
    h1 = _layer_norm(x2 + attn @ wp + bp, g1, be1)
    m = _gelu_tanh(h1 @ w1 + b1)
    m = _gelu_tanh(m @ w2 + b2)
    out = _layer_norm(h1 + m, g2, be2)
    return out.reshape(b, n, dim)


if __name__ == "__main__":
    key = jax.random.PRNGKey(0)
    ks = jax.random.split(key, 20)

    x = jax.random.normal(ks[0], (B, N, DIM), dtype=jnp.float32)

    # Per-head Linear(dim, d) params laid out side-by-side in head order, then Q|K|V packed.
    bound = 1.0 / (DIM ** 0.5)
    wq = jax.random.uniform(ks[1], (DIM, DIM), jnp.float32, -bound, bound)
    wk = jax.random.uniform(ks[2], (DIM, DIM), jnp.float32, -bound, bound)
    wv = jax.random.uniform(ks[3], (DIM, DIM), jnp.float32, -bound, bound)
    bq = jax.random.uniform(ks[4], (1, DIM), jnp.float32, -bound, bound)
    bk = jax.random.uniform(ks[5], (1, DIM), jnp.float32, -bound, bound)
    bv = jax.random.uniform(ks[6], (1, DIM), jnp.float32, -bound, bound)
    wqkv = jnp.concatenate([wq, wk, wv], axis=1)     # (DIM, 3*DIM)
    bqkv = jnp.concatenate([bq, bk, bv], axis=1)     # (1, 3*DIM)

    # MultiHeadAttention output projector.
    wp = jax.random.uniform(ks[7], (DIM, DIM), jnp.float32, -bound, bound)
    bp = jax.random.uniform(ks[8], (1, DIM), jnp.float32, -bound, bound)

    # MLP.
    w1 = jax.random.uniform(ks[9], (DIM, HIDDEN), jnp.float32, -bound, bound)
    b1 = jax.random.uniform(ks[10], (1, HIDDEN), jnp.float32, -bound, bound)
    bound2 = 1.0 / (HIDDEN ** 0.5)
    w2 = jax.random.uniform(ks[11], (HIDDEN, DIM), jnp.float32, -bound2, bound2)
    b2 = jax.random.uniform(ks[12], (1, DIM), jnp.float32, -bound2, bound2)

    # LayerNorm params (non-trivial values to exercise the affine path).
    g1 = 1.0 + 0.05 * jax.random.normal(ks[13], (1, DIM), jnp.float32)
    be1 = 0.05 * jax.random.normal(ks[14], (1, DIM), jnp.float32)
    g2 = 1.0 + 0.05 * jax.random.normal(ks[15], (1, DIM), jnp.float32)
    be2 = 0.05 * jax.random.normal(ks[16], (1, DIM), jnp.float32)

    # Pack all the tiny (1, DIM) vectors into one (6, DIM) ref.
    vec = jnp.concatenate([bp, g1, be1, b2, g2, be2], axis=0)

    out = encoder(x, wqkv, bqkv, wp, w1, b1, w2, vec)
    out = jax.block_until_ready(out)

    ref = reference(x, wqkv, bqkv, wp, w1, b1, w2, vec)
    assert out.shape == (B, N, DIM), out.shape
    # Tolerance accounts for the approximate EUP reciprocal in the softmax denominator.
    assert jnp.allclose(out, ref, atol=5e-3, rtol=5e-3), float(jnp.abs(out - ref).max())

    print("KERNEL_OK")
</pallas_src>

<mosaic_0001>
module attributes {stable_mosaic.version = 11 : i64} {
  func.func @encoder_kernel(%arg0: memref<2x8x32xf32, #tpu.memory_space<vmem>>, %arg1: memref<32x96xf32, #tpu.memory_space<vmem>>, %arg2: memref<1x96xf32, #tpu.memory_space<vmem>>, %arg3: memref<32x32xf32, #tpu.memory_space<vmem>>, %arg4: memref<32x128xf32, #tpu.memory_space<vmem>>, %arg5: memref<1x128xf32, #tpu.memory_space<vmem>>, %arg6: memref<128x32xf32, #tpu.memory_space<vmem>>, %arg7: memref<6x32xf32, #tpu.memory_space<vmem>>, %arg8: memref<2x8x32xf32, #tpu.memory_space<vmem>>) attributes {dimension_semantics = [], scalar_prefetch = 0 : i64, scratch_operands = 0 : i64, tpu.core_type = #tpu.core_type<tc>} {
    %c0 = arith.constant 0 : index
    %c0_0 = arith.constant 0 : index
    %c0_1 = arith.constant 0 : index
    %0 = vector.load %arg0[%c0, %c0_0, %c0_1] : memref<2x8x32xf32, #tpu.memory_space<vmem>>, vector<2x8x32xf32>
    %1 = vector.shape_cast %0 : vector<2x8x32xf32> to vector<16x32xf32>
    %c0_2 = arith.constant 0 : index
    %c0_3 = arith.constant 0 : index
    %2 = vector.load %arg1[%c0_2, %c0_3] : memref<32x96xf32, #tpu.memory_space<vmem>>, vector<32x96xf32>
    %cst = arith.constant dense<0.000000e+00> : vector<16x96xf32>
    %3 = tpu.matmul %1, %2, %cst {dimension_numbers = #tpu.dot_dimension_numbers<[1], [0], [0], [1], [0, 0, 1, 1], [], []>} : vector<16x32xf32>, vector<32x96xf32>, vector<16x96xf32> -> vector<16x96xf32>
    %c0_4 = arith.constant 0 : index
    %c0_5 = arith.constant 0 : index
    %4 = vector.load %arg2[%c0_4, %c0_5] : memref<1x96xf32, #tpu.memory_space<vmem>>, vector<1x96xf32>
    %5 = vector.broadcast %4 : vector<1x96xf32> to vector<16x96xf32>
    %6 = arith.addf %3, %5 : vector<16x96xf32>
    %7 = vector.shape_cast %6 : vector<16x96xf32> to vector<2x8x96xf32>
    %8 = vector.extract_strided_slice %7 {offsets = [0, 0, 0], sizes = [2, 8, 4], strides = [1, 1, 1]} : vector<2x8x96xf32> to vector<2x8x4xf32>
    %9 = vector.extract_strided_slice %7 {offsets = [0, 0, 32], sizes = [2, 8, 4], strides = [1, 1, 1]} : vector<2x8x96xf32> to vector<2x8x4xf32>
    %10 = vector.extract_strided_slice %7 {offsets = [0, 0, 64], sizes = [2, 8, 4], strides = [1, 1, 1]} : vector<2x8x96xf32> to vector<2x8x4xf32>
    "tpu.trace_start"() <{level = 10 : i32, message = "bqd,bkd->bqk"}> : () -> ()
    %cst_6 = arith.constant dense<0.000000e+00> : vector<2x8x8xf32>
    %11 = tpu.matmul %8, %9, %cst_6 {dimension_numbers = #tpu.dot_dimension_numbers<[2], [2], [1], [1], [0, 0, 0, 1, 1, 1], [0], [0]>} : vector<2x8x4xf32>, vector<2x8x4xf32>, vector<2x8x8xf32> -> vector<2x8x8xf32>
    "tpu.trace_stop"() : () -> ()
    %cst_7 = arith.constant 5.000000e-01 : f32
    %12 = vector.broadcast %cst_7 : f32 to vector<2x8x8xf32>
    %13 = arith.mulf %11, %12 : vector<2x8x8xf32>
    %cst_8 = arith.constant dense<0xFF800000> : vector<2x8xf32>
    %14 = vector.multi_reduction <maximumf>, %13, %cst_8 [1] : vector<2x8x8xf32> to vector<2x8xf32>
    %15 = vector.shape_cast %14 : vector<2x8xf32> to vector<2x1x8xf32>
    %16 = vector.broadcast %15 : vector<2x1x8xf32> to vector<2x8x8xf32>
    %17 = arith.subf %13, %16 : vector<2x8x8xf32>
    %18 = math.exp %17 : vector<2x8x8xf32>
    %cst_9 = arith.constant dense<0.000000e+00> : vector<2x8xf32>
    %19 = vector.multi_reduction <add>, %18, %cst_9 [1] : vector<2x8x8xf32> to vector<2x8xf32>
    %20 = vector.shape_cast %19 : vector<2x8xf32> to vector<2x1x8xf32>
    %21 = tpu.reciprocal %20 {approx = true} : vector<2x1x8xf32> -> vector<2x1x8xf32>
    %22 = vector.broadcast %21 : vector<2x1x8xf32> to vector<2x8x8xf32>
    %23 = arith.mulf %18, %22 : vector<2x8x8xf32>
    "tpu.trace_start"() <{level = 10 : i32, message = "bqk,bkd->bqd"}> : () -> ()
    %cst_10 = arith.constant dense<0.000000e+00> : vector<2x8x4xf32>
    %24 = tpu.matmul %23, %10, %cst_10 {dimension_numbers = #tpu.dot_dimension_numbers<[2], [1], [1], [2], [0, 0, 0, 1, 1, 2], [0], [0]>} : vector<2x8x8xf32>, vector<2x8x4xf32>, vector<2x8x4xf32> -> vector<2x8x4xf32>
    "tpu.trace_stop"() : () -> ()
    %25 = vector.extract_strided_slice %7 {offsets = [0, 0, 4], sizes = [2, 8, 4], strides = [1, 1, 1]} : vector<2x8x96xf32> to vector<2x8x4xf32>
    %26 = vector.extract_strided_slice %7 {offsets = [0, 0, 36], sizes = [2, 8, 4], strides = [1, 1, 1]} : vector<2x8x96xf32> to vector<2x8x4xf32>
    %27 = vector.extract_strided_slice %7 {offsets = [0, 0, 68], sizes = [2, 8, 4], strides = [1, 1, 1]} : vector<2x8x96xf32> to vector<2x8x4xf32>
    "tpu.trace_start"() <{level = 10 : i32, message = "bqd,bkd->bqk"}> : () -> ()
    %cst_11 = arith.constant dense<0.000000e+00> : vector<2x8x8xf32>
    %28 = tpu.matmul %25, %26, %cst_11 {dimension_numbers = #tpu.dot_dimension_numbers<[2], [2], [1], [1], [0, 0, 0, 1, 1, 1], [0], [0]>} : vector<2x8x4xf32>, vector<2x8x4xf32>, vector<2x8x8xf32> -> vector<2x8x8xf32>
    "tpu.trace_stop"() : () -> ()
    %cst_12 = arith.constant 5.000000e-01 : f32
    %29 = vector.broadcast %cst_12 : f32 to vector<2x8x8xf32>
    %30 = arith.mulf %28, %29 : vector<2x8x8xf32>
    %cst_13 = arith.constant dense<0xFF800000> : vector<2x8xf32>
    %31 = vector.multi_reduction <maximumf>, %30, %cst_13 [1] : vector<2x8x8xf32> to vector<2x8xf32>
    %32 = vector.shape_cast %31 : vector<2x8xf32> to vector<2x1x8xf32>
    %33 = vector.broadcast %32 : vector<2x1x8xf32> to vector<2x8x8xf32>
    %34 = arith.subf %30, %33 : vector<2x8x8xf32>
    %35 = math.exp %34 : vector<2x8x8xf32>
    %cst_14 = arith.constant dense<0.000000e+00> : vector<2x8xf32>
    %36 = vector.multi_reduction <add>, %35, %cst_14 [1] : vector<2x8x8xf32> to vector<2x8xf32>
    %37 = vector.shape_cast %36 : vector<2x8xf32> to vector<2x1x8xf32>
    %38 = tpu.reciprocal %37 {approx = true} : vector<2x1x8xf32> -> vector<2x1x8xf32>
    %39 = vector.broadcast %38 : vector<2x1x8xf32> to vector<2x8x8xf32>
    %40 = arith.mulf %35, %39 : vector<2x8x8xf32>
    "tpu.trace_start"() <{level = 10 : i32, message = "bqk,bkd->bqd"}> : () -> ()
    %cst_15 = arith.constant dense<0.000000e+00> : vector<2x8x4xf32>
    %41 = tpu.matmul %40, %27, %cst_15 {dimension_numbers = #tpu.dot_dimension_numbers<[2], [1], [1], [2], [0, 0, 0, 1, 1, 2], [0], [0]>} : vector<2x8x8xf32>, vector<2x8x4xf32>, vector<2x8x4xf32> -> vector<2x8x4xf32>
    "tpu.trace_stop"() : () -> ()
    %42 = vector.extract_strided_slice %7 {offsets = [0, 0, 8], sizes = [2, 8, 4], strides = [1, 1, 1]} : vector<2x8x96xf32> to vector<2x8x4xf32>
    %43 = vector.extract_strided_slice %7 {offsets = [0, 0, 40], sizes = [2, 8, 4], strides = [1, 1, 1]} : vector<2x8x96xf32> to vector<2x8x4xf32>
    %44 = vector.extract_strided_slice %7 {offsets = [0, 0, 72], sizes = [2, 8, 4], strides = [1, 1, 1]} : vector<2x8x96xf32> to vector<2x8x4xf32>
    "tpu.trace_start"() <{level = 10 : i32, message = "bqd,bkd->bqk"}> : () -> ()
    %cst_16 = arith.constant dense<0.000000e+00> : vector<2x8x8xf32>
    %45 = tpu.matmul %42, %43, %cst_16 {dimension_numbers = #tpu.dot_dimension_numbers<[2], [2], [1], [1], [0, 0, 0, 1, 1, 1], [0], [0]>} : vector<2x8x4xf32>, vector<2x8x4xf32>, vector<2x8x8xf32> -> vector<2x8x8xf32>
    "tpu.trace_stop"() : () -> ()
    %cst_17 = arith.constant 5.000000e-01 : f32
    %46 = vector.broadcast %cst_17 : f32 to vector<2x8x8xf32>
    %47 = arith.mulf %45, %46 : vector<2x8x8xf32>
    %cst_18 = arith.constant dense<0xFF800000> : vector<2x8xf32>
    %48 = vector.multi_reduction <maximumf>, %47, %cst_18 [1] : vector<2x8x8xf32> to vector<2x8xf32>
    %49 = vector.shape_cast %48 : vector<2x8xf32> to vector<2x1x8xf32>
    %50 = vector.broadcast %49 : vector<2x1x8xf32> to vector<2x8x8xf32>
    %51 = arith.subf %47, %50 : vector<2x8x8xf32>
    %52 = math.exp %51 : vector<2x8x8xf32>
    %cst_19 = arith.constant dense<0.000000e+00> : vector<2x8xf32>
    %53 = vector.multi_reduction <add>, %52, %cst_19 [1] : vector<2x8x8xf32> to vector<2x8xf32>
    %54 = vector.shape_cast %53 : vector<2x8xf32> to vector<2x1x8xf32>
    %55 = tpu.reciprocal %54 {approx = true} : vector<2x1x8xf32> -> vector<2x1x8xf32>
    %56 = vector.broadcast %55 : vector<2x1x8xf32> to vector<2x8x8xf32>
    %57 = arith.mulf %52, %56 : vector<2x8x8xf32>
    "tpu.trace_start"() <{level = 10 : i32, message = "bqk,bkd->bqd"}> : () -> ()
    %cst_20 = arith.constant dense<0.000000e+00> : vector<2x8x4xf32>
    %58 = tpu.matmul %57, %44, %cst_20 {dimension_numbers = #tpu.dot_dimension_numbers<[2], [1], [1], [2], [0, 0, 0, 1, 1, 2], [0], [0]>} : vector<2x8x8xf32>, vector<2x8x4xf32>, vector<2x8x4xf32> -> vector<2x8x4xf32>
    "tpu.trace_stop"() : () -> ()
    %59 = vector.extract_strided_slice %7 {offsets = [0, 0, 12], sizes = [2, 8, 4], strides = [1, 1, 1]} : vector<2x8x96xf32> to vector<2x8x4xf32>
    %60 = vector.extract_strided_slice %7 {offsets = [0, 0, 44], sizes = [2, 8, 4], strides = [1, 1, 1]} : vector<2x8x96xf32> to vector<2x8x4xf32>
    %61 = vector.extract_strided_slice %7 {offsets = [0, 0, 76], sizes = [2, 8, 4], strides = [1, 1, 1]} : vector<2x8x96xf32> to vector<2x8x4xf32>
    "tpu.trace_start"() <{level = 10 : i32, message = "bqd,bkd->bqk"}> : () -> ()
    %cst_21 = arith.constant dense<0.000000e+00> : vector<2x8x8xf32>
    %62 = tpu.matmul %59, %60, %cst_21 {dimension_numbers = #tpu.dot_dimension_numbers<[2], [2], [1], [1], [0, 0, 0, 1, 1, 1], [0], [0]>} : vector<2x8x4xf32>, vector<2x8x4xf32>, vector<2x8x8xf32> -> vector<2x8x8xf32>
    "tpu.trace_stop"() : () -> ()
    %cst_22 = arith.constant 5.000000e-01 : f32
    %63 = vector.broadcast %cst_22 : f32 to vector<2x8x8xf32>
    %64 = arith.mulf %62, %63 : vector<2x8x8xf32>
    %cst_23 = arith.constant dense<0xFF800000> : vector<2x8xf32>
    %65 = vector.multi_reduction <maximumf>, %64, %cst_23 [1] : vector<2x8x8xf32> to vector<2x8xf32>
    %66 = vector.shape_cast %65 : vector<2x8xf32> to vector<2x1x8xf32>
    %67 = vector.broadcast %66 : vector<2x1x8xf32> to vector<2x8x8xf32>
    %68 = arith.subf %64, %67 : vector<2x8x8xf32>
    %69 = math.exp %68 : vector<2x8x8xf32>
    %cst_24 = arith.constant dense<0.000000e+00> : vector<2x8xf32>
    %70 = vector.multi_reduction <add>, %69, %cst_24 [1] : vector<2x8x8xf32> to vector<2x8xf32>
    %71 = vector.shape_cast %70 : vector<2x8xf32> to vector<2x1x8xf32>
    %72 = tpu.reciprocal %71 {approx = true} : vector<2x1x8xf32> -> vector<2x1x8xf32>
    %73 = vector.broadcast %72 : vector<2x1x8xf32> to vector<2x8x8xf32>
    %74 = arith.mulf %69, %73 : vector<2x8x8xf32>
    "tpu.trace_start"() <{level = 10 : i32, message = "bqk,bkd->bqd"}> : () -> ()
    %cst_25 = arith.constant dense<0.000000e+00> : vector<2x8x4xf32>
    %75 = tpu.matmul %74, %61, %cst_25 {dimension_numbers = #tpu.dot_dimension_numbers<[2], [1], [1], [2], [0, 0, 0, 1, 1, 2], [0], [0]>} : vector<2x8x8xf32>, vector<2x8x4xf32>, vector<2x8x4xf32> -> vector<2x8x4xf32>
    "tpu.trace_stop"() : () -> ()
    %76 = vector.extract_strided_slice %7 {offsets = [0, 0, 16], sizes = [2, 8, 4], strides = [1, 1, 1]} : vector<2x8x96xf32> to vector<2x8x4xf32>
    %77 = vector.extract_strided_slice %7 {offsets = [0, 0, 48], sizes = [2, 8, 4], strides = [1, 1, 1]} : vector<2x8x96xf32> to vector<2x8x4xf32>
    %78 = vector.extract_strided_slice %7 {offsets = [0, 0, 80], sizes = [2, 8, 4], strides = [1, 1, 1]} : vector<2x8x96xf32> to vector<2x8x4xf32>
    "tpu.trace_start"() <{level = 10 : i32, message = "bqd,bkd->bqk"}> : () -> ()
    %cst_26 = arith.constant dense<0.000000e+00> : vector<2x8x8xf32>
    %79 = tpu.matmul %76, %77, %cst_26 {dimension_numbers = #tpu.dot_dimension_numbers<[2], [2], [1], [1], [0, 0, 0, 1, 1, 1], [0], [0]>} : vector<2x8x4xf32>, vector<2x8x4xf32>, vector<2x8x8xf32> -> vector<2x8x8xf32>
    "tpu.trace_stop"() : () -> ()
    %cst_27 = arith.constant 5.000000e-01 : f32
    %80 = vector.broadcast %cst_27 : f32 to vector<2x8x8xf32>
    %81 = arith.mulf %79, %80 : vector<2x8x8xf32>
    %cst_28 = arith.constant dense<0xFF800000> : vector<2x8xf32>
    %82 = vector.multi_reduction <maximumf>, %81, %cst_28 [1] : vector<2x8x8xf32> to vector<2x8xf32>
    %83 = vector.shape_cast %82 : vector<2x8xf32> to vector<2x1x8xf32>
    %84 = vector.broadcast %83 : vector<2x1x8xf32> to vector<2x8x8xf32>
    %85 = arith.subf %81, %84 : vector<2x8x8xf32>
    %86 = math.exp %85 : vector<2x8x8xf32>
    %cst_29 = arith.constant dense<0.000000e+00> : vector<2x8xf32>
    %87 = vector.multi_reduction <add>, %86, %cst_29 [1] : vector<2x8x8xf32> to vector<2x8xf32>
    %88 = vector.shape_cast %87 : vector<2x8xf32> to vector<2x1x8xf32>
    %89 = tpu.reciprocal %88 {approx = true} : vector<2x1x8xf32> -> vector<2x1x8xf32>
    %90 = vector.broadcast %89 : vector<2x1x8xf32> to vector<2x8x8xf32>
    %91 = arith.mulf %86, %90 : vector<2x8x8xf32>
    "tpu.trace_start"() <{level = 10 : i32, message = "bqk,bkd->bqd"}> : () -> ()
    %cst_30 = arith.constant dense<0.000000e+00> : vector<2x8x4xf32>
    %92 = tpu.matmul %91, %78, %cst_30 {dimension_numbers = #tpu.dot_dimension_numbers<[2], [1], [1], [2], [0, 0, 0, 1, 1, 2], [0], [0]>} : vector<2x8x8xf32>, vector<2x8x4xf32>, vector<2x8x4xf32> -> vector<2x8x4xf32>
    "tpu.trace_stop"() : () -> ()
    %93 = vector.extract_strided_slice %7 {offsets = [0, 0, 20], sizes = [2, 8, 4], strides = [1, 1, 1]} : vector<2x8x96xf32> to vector<2x8x4xf32>
    %94 = vector.extract_strided_slice %7 {offsets = [0, 0, 52], sizes = [2, 8, 4], strides = [1, 1, 1]} : vector<2x8x96xf32> to vector<2x8x4xf32>
    %95 = vector.extract_strided_slice %7 {offsets = [0, 0, 84], sizes = [2, 8, 4], strides = [1, 1, 1]} : vector<2x8x96xf32> to vector<2x8x4xf32>
    "tpu.trace_start"() <{level = 10 : i32, message = "bqd,bkd->bqk"}> : () -> ()
    %cst_31 = arith.constant dense<0.000000e+00> : vector<2x8x8xf32>
    %96 = tpu.matmul %93, %94, %cst_31 {dimension_numbers = #tpu.dot_dimension_numbers<[2], [2], [1], [1], [0, 0, 0, 1, 1, 1], [0], [0]>} : vector<2x8x4xf32>, vector<2x8x4xf32>, vector<2x8x8xf32> -> vector<2x8x8xf32>
    "tpu.trace_stop"() : () -> ()
    %cst_32 = arith.constant 5.000000e-01 : f32
    %97 = vector.broadcast %cst_32 : f32 to vector<2x8x8xf32>
    %98 = arith.mulf %96, %97 : vector<2x8x8xf32>
    %cst_33 = arith.constant dense<0xFF800000> : vector<2x8xf32>
    %99 = vector.multi_reduction <maximumf>, %98, %cst_33 [1] : vector<2x8x8xf32> to vector<2x8xf32>
    %100 = vector.shape_cast %99 : vector<2x8xf32> to vector<2x1x8xf32>
    %101 = vector.broadcast %100 : vector<2x1x8xf32> to vector<2x8x8xf32>
    %102 = arith.subf %98, %101 : vector<2x8x8xf32>
    %103 = math.exp %102 : vector<2x8x8xf32>
    %cst_34 = arith.constant dense<0.000000e+00> : vector<2x8xf32>
    %104 = vector.multi_reduction <add>, %103, %cst_34 [1] : vector<2x8x8xf32> to vector<2x8xf32>
    %105 = vector.shape_cast %104 : vector<2x8xf32> to vector<2x1x8xf32>
    %106 = tpu.reciprocal %105 {approx = true} : vector<2x1x8xf32> -> vector<2x1x8xf32>
    %107 = vector.broadcast %106 : vector<2x1x8xf32> to vector<2x8x8xf32>
    %108 = arith.mulf %103, %107 : vector<2x8x8xf32>
    "tpu.trace_start"() <{level = 10 : i32, message = "bqk,bkd->bqd"}> : () -> ()
    %cst_35 = arith.constant dense<0.000000e+00> : vector<2x8x4xf32>
    %109 = tpu.matmul %108, %95, %cst_35 {dimension_numbers = #tpu.dot_dimension_numbers<[2], [1], [1], [2], [0, 0, 0, 1, 1, 2], [0], [0]>} : vector<2x8x8xf32>, vector<2x8x4xf32>, vector<2x8x4xf32> -> vector<2x8x4xf32>
    "tpu.trace_stop"() : () -> ()
    %110 = vector.extract_strided_slice %7 {offsets = [0, 0, 24], sizes = [2, 8, 4], strides = [1, 1, 1]} : vector<2x8x96xf32> to vector<2x8x4xf32>
    %111 = vector.extract_strided_slice %7 {offsets = [0, 0, 56], sizes = [2, 8, 4], strides = [1, 1, 1]} : vector<2x8x96xf32> to vector<2x8x4xf32>
    %112 = vector.extract_strided_slice %7 {offsets = [0, 0, 88], sizes = [2, 8, 4], strides = [1, 1, 1]} : vector<2x8x96xf32> to vector<2x8x4xf32>
    "tpu.trace_start"() <{level = 10 : i32, message = "bqd,bkd->bqk"}> : () -> ()
    %cst_36 = arith.constant dense<0.000000e+00> : vector<2x8x8xf32>
    %113 = tpu.matmul %110, %111, %cst_36 {dimension_numbers = #tpu.dot_dimension_numbers<[2], [2], [1], [1], [0, 0, 0, 1, 1, 1], [0], [0]>} : vector<2x8x4xf32>, vector<2x8x4xf32>, vector<2x8x8xf32> -> vector<2x8x8xf32>
    "tpu.trace_stop"() : () -> ()
    %cst_37 = arith.constant 5.000000e-01 : f32
    %114 = vector.broadcast %cst_37 : f32 to vector<2x8x8xf32>
    %115 = arith.mulf %113, %114 : vector<2x8x8xf32>
    %cst_38 = arith.constant dense<0xFF800000> : vector<2x8xf32>
    %116 = vector.multi_reduction <maximumf>, %115, %cst_38 [1] : vector<2x8x8xf32> to vector<2x8xf32>
    %117 = vector.shape_cast %116 : vector<2x8xf32> to vector<2x1x8xf32>
    %118 = vector.broadcast %117 : vector<2x1x8xf32> to vector<2x8x8xf32>
    %119 = arith.subf %115, %118 : vector<2x8x8xf32>
    %120 = math.exp %119 : vector<2x8x8xf32>
    %cst_39 = arith.constant dense<0.000000e+00> : vector<2x8xf32>
    %121 = vector.multi_reduction <add>, %120, %cst_39 [1] : vector<2x8x8xf32> to vector<2x8xf32>
    %122 = vector.shape_cast %121 : vector<2x8xf32> to vector<2x1x8xf32>
    %123 = tpu.reciprocal %122 {approx = true} : vector<2x1x8xf32> -> vector<2x1x8xf32>
    %124 = vector.broadcast %123 : vector<2x1x8xf32> to vector<2x8x8xf32>
    %125 = arith.mulf %120, %124 : vector<2x8x8xf32>
    "tpu.trace_start"() <{level = 10 : i32, message = "bqk,bkd->bqd"}> : () -> ()
    %cst_40 = arith.constant dense<0.000000e+00> : vector<2x8x4xf32>
    %126 = tpu.matmul %125, %112, %cst_40 {dimension_numbers = #tpu.dot_dimension_numbers<[2], [1], [1], [2], [0, 0, 0, 1, 1, 2], [0], [0]>} : vector<2x8x8xf32>, vector<2x8x4xf32>, vector<2x8x4xf32> -> vector<2x8x4xf32>
    "tpu.trace_stop"() : () -> ()
    %127 = vector.extract_strided_slice %7 {offsets = [0, 0, 28], sizes = [2, 8, 4], strides = [1, 1, 1]} : vector<2x8x96xf32> to vector<2x8x4xf32>
    %128 = vector.extract_strided_slice %7 {offsets = [0, 0, 60], sizes = [2, 8, 4], strides = [1, 1, 1]} : vector<2x8x96xf32> to vector<2x8x4xf32>
    %129 = vector.extract_strided_slice %7 {offsets = [0, 0, 92], sizes = [2, 8, 4], strides = [1, 1, 1]} : vector<2x8x96xf32> to vector<2x8x4xf32>
    "tpu.trace_start"() <{level = 10 : i32, message = "bqd,bkd->bqk"}> : () -> ()
    %cst_41 = arith.constant dense<0.000000e+00> : vector<2x8x8xf32>
    %130 = tpu.matmul %127, %128, %cst_41 {dimension_numbers = #tpu.dot_dimension_numbers<[2], [2], [1], [1], [0, 0, 0, 1, 1, 1], [0], [0]>} : vector<2x8x4xf32>, vector<2x8x4xf32>, vector<2x8x8xf32> -> vector<2x8x8xf32>
    "tpu.trace_stop"() : () -> ()
    %cst_42 = arith.constant 5.000000e-01 : f32
    %131 = vector.broadcast %cst_42 : f32 to vector<2x8x8xf32>
    %132 = arith.mulf %130, %131 : vector<2x8x8xf32>
    %cst_43 = arith.constant dense<0xFF800000> : vector<2x8xf32>
    %133 = vector.multi_reduction <maximumf>, %132, %cst_43 [1] : vector<2x8x8xf32> to vector<2x8xf32>
    %134 = vector.shape_cast %133 : vector<2x8xf32> to vector<2x1x8xf32>
    %135 = vector.broadcast %134 : vector<2x1x8xf32> to vector<2x8x8xf32>
    %136 = arith.subf %132, %135 : vector<2x8x8xf32>
    %137 = math.exp %136 : vector<2x8x8xf32>
    %cst_44 = arith.constant dense<0.000000e+00> : vector<2x8xf32>
    %138 = vector.multi_reduction <add>, %137, %cst_44 [1] : vector<2x8x8xf32> to vector<2x8xf32>
    %139 = vector.shape_cast %138 : vector<2x8xf32> to vector<2x1x8xf32>
    %140 = tpu.reciprocal %139 {approx = true} : vector<2x1x8xf32> -> vector<2x1x8xf32>
    %141 = vector.broadcast %140 : vector<2x1x8xf32> to vector<2x8x8xf32>
    %142 = arith.mulf %137, %141 : vector<2x8x8xf32>
    "tpu.trace_start"() <{level = 10 : i32, message = "bqk,bkd->bqd"}> : () -> ()
    %cst_45 = arith.constant dense<0.000000e+00> : vector<2x8x4xf32>
    %143 = tpu.matmul %142, %129, %cst_45 {dimension_numbers = #tpu.dot_dimension_numbers<[2], [1], [1], [2], [0, 0, 0, 1, 1, 2], [0], [0]>} : vector<2x8x8xf32>, vector<2x8x4xf32>, vector<2x8x4xf32> -> vector<2x8x4xf32>
    "tpu.trace_stop"() : () -> ()
    %144 = tpu.concatenate %24, %41, %58, %75, %92, %109, %126, %143 in 2 : vector<2x8x4xf32>, vector<2x8x4xf32>, vector<2x8x4xf32>, vector<2x8x4xf32>, vector<2x8x4xf32>, vector<2x8x4xf32>, vector<2x8x4xf32>, vector<2x8x4xf32> -> vector<2x8x32xf32>
    %145 = vector.shape_cast %144 : vector<2x8x32xf32> to vector<16x32xf32>
    %c0_46 = arith.constant 0 : index
    %c0_47 = arith.constant 0 : index
    %146 = vector.load %arg7[%c0_46, %c0_47] : memref<6x32xf32, #tpu.memory_space<vmem>>, vector<1x32xf32>
    %c1 = arith.constant 1 : index
    %c0_48 = arith.constant 0 : index
    %147 = vector.load %arg7[%c1, %c0_48] : memref<6x32xf32, #tpu.memory_space<vmem>>, vector<1x32xf32>
    %c2 = arith.constant 2 : index
    %c0_49 = arith.constant 0 : index
    %148 = vector.load %arg7[%c2, %c0_49] : memref<6x32xf32, #tpu.memory_space<vmem>>, vector<1x32xf32>
    %c3 = arith.constant 3 : index
    %c0_50 = arith.constant 0 : index
    %149 = vector.load %arg7[%c3, %c0_50] : memref<6x32xf32, #tpu.memory_space<vmem>>, vector<1x32xf32>
    %c4 = arith.constant 4 : index
    %c0_51 = arith.constant 0 : index
    %150 = vector.load %arg7[%c4, %c0_51] : memref<6x32xf32, #tpu.memory_space<vmem>>, vector<1x32xf32>
    %c5 = arith.constant 5 : index
    %c0_52 = arith.constant 0 : index
    %151 = vector.load %arg7[%c5, %c0_52] : memref<6x32xf32, #tpu.memory_space<vmem>>, vector<1x32xf32>
    %c0_53 = arith.constant 0 : index
    %c0_54 = arith.constant 0 : index
    %152 = vector.load %arg3[%c0_53, %c0_54] : memref<32x32xf32, #tpu.memory_space<vmem>>, vector<32x32xf32>
    %cst_55 = arith.constant dense<0.000000e+00> : vector<16x32xf32>
    %153 = tpu.matmul %145, %152, %cst_55 {dimension_numbers = #tpu.dot_dimension_numbers<[1], [0], [0], [1], [0, 0, 1, 1], [], []>} : vector<16x32xf32>, vector<32x32xf32>, vector<16x32xf32> -> vector<16x32xf32>
    %154 = vector.broadcast %146 : vector<1x32xf32> to vector<16x32xf32>
    %155 = arith.addf %153, %154 : vector<16x32xf32>
    %156 = arith.addf %1, %155 : vector<16x32xf32>
    %cst_56 = arith.constant dense<0.000000e+00> : vector<16xf32>
    %157 = vector.multi_reduction <add>, %156, %cst_56 [1] : vector<16x32xf32> to vector<16xf32>
    %158 = vector.shape_cast %157 : vector<16xf32> to vector<16x1xf32>
    %cst_57 = arith.constant 3.200000e+01 : f32
    %159 = vector.broadcast %cst_57 : f32 to vector<16x1xf32>
    %160 = arith.divf %158, %159 : vector<16x1xf32>
    %161 = vector.broadcast %160 : vector<16x1xf32> to vector<16x32xf32>
    %162 = arith.subf %156, %161 : vector<16x32xf32>
    %163 = arith.mulf %162, %162 : vector<16x32xf32>
    %cst_58 = arith.constant dense<0.000000e+00> : vector<16xf32>
    %164 = vector.multi_reduction <add>, %163, %cst_58 [1] : vector<16x32xf32> to vector<16xf32>
    %165 = vector.shape_cast %164 : vector<16xf32> to vector<16x1xf32>
    %cst_59 = arith.constant 3.200000e+01 : f32
    %166 = vector.broadcast %cst_59 : f32 to vector<16x1xf32>
    %167 = arith.divf %165, %166 : vector<16x1xf32>
    %168 = vector.broadcast %160 : vector<16x1xf32> to vector<16x32xf32>
    %169 = arith.subf %156, %168 : vector<16x32xf32>
    %cst_60 = arith.constant 9.99999974E-6 : f32
    %170 = vector.broadcast %cst_60 : f32 to vector<16x1xf32>
    %171 = arith.addf %167, %170 : vector<16x1xf32>
    %172 = math.rsqrt %171 : vector<16x1xf32>
    %173 = vector.broadcast %172 : vector<16x1xf32> to vector<16x32xf32>
    %174 = arith.mulf %169, %173 : vector<16x32xf32>
    %175 = vector.broadcast %147 : vector<1x32xf32> to vector<16x32xf32>
    %176 = arith.mulf %174, %175 : vector<16x32xf32>
    %177 = vector.broadcast %148 : vector<1x32xf32> to vector<16x32xf32>
    %178 = arith.addf %176, %177 : vector<16x32xf32>
    %c0_61 = arith.constant 0 : index
    %c0_62 = arith.constant 0 : index
    %179 = vector.load %arg4[%c0_61, %c0_62] : memref<32x128xf32, #tpu.memory_space<vmem>>, vector<32x128xf32>
    %cst_63 = arith.constant dense<0.000000e+00> : vector<16x128xf32>
    %180 = tpu.matmul %178, %179, %cst_63 {dimension_numbers = #tpu.dot_dimension_numbers<[1], [0], [0], [1], [0, 0, 1, 1], [], []>} : vector<16x32xf32>, vector<32x128xf32>, vector<16x128xf32> -> vector<16x128xf32>
    %c0_64 = arith.constant 0 : index
    %c0_65 = arith.constant 0 : index
    %181 = vector.load %arg5[%c0_64, %c0_65] : memref<1x128xf32, #tpu.memory_space<vmem>>, vector<1x128xf32>
    %182 = vector.broadcast %181 : vector<1x128xf32> to vector<16x128xf32>
    %183 = arith.addf %180, %182 : vector<16x128xf32>
    %cst_66 = arith.constant 5.000000e-01 : f32
    %184 = vector.broadcast %cst_66 : f32 to vector<16x128xf32>
    %185 = arith.mulf %184, %183 : vector<16x128xf32>
    %cst_67 = arith.constant 4.471500e-02 : f32
    %186 = vector.broadcast %cst_67 : f32 to vector<16x128xf32>
    %187 = arith.mulf %186, %183 : vector<16x128xf32>
    %188 = arith.mulf %187, %183 : vector<16x128xf32>
    %189 = arith.mulf %188, %183 : vector<16x128xf32>
    %190 = arith.addf %183, %189 : vector<16x128xf32>
    %cst_68 = arith.constant 0.797884583 : f32
    %191 = vector.broadcast %cst_68 : f32 to vector<16x128xf32>
    %192 = arith.mulf %191, %190 : vector<16x128xf32>
    %193 = math.tanh %192 : vector<16x128xf32>
    %cst_69 = arith.constant 1.000000e+00 : f32
    %194 = vector.broadcast %cst_69 : f32 to vector<16x128xf32>
    %195 = arith.addf %194, %193 : vector<16x128xf32>
    %196 = arith.mulf %185, %195 : vector<16x128xf32>
    %c0_70 = arith.constant 0 : index
    %c0_71 = arith.constant 0 : index
    %197 = vector.load %arg6[%c0_70, %c0_71] : memref<128x32xf32, #tpu.memory_space<vmem>>, vector<128x32xf32>
    %cst_72 = arith.constant dense<0.000000e+00> : vector<16x32xf32>
    %198 = tpu.matmul %196, %197, %cst_72 {dimension_numbers = #tpu.dot_dimension_numbers<[1], [0], [0], [1], [0, 0, 1, 1], [], []>} : vector<16x128xf32>, vector<128x32xf32>, vector<16x32xf32> -> vector<16x32xf32>
    %199 = vector.broadcast %149 : vector<1x32xf32> to vector<16x32xf32>
    %200 = arith.addf %198, %199 : vector<16x32xf32>
    %cst_73 = arith.constant 5.000000e-01 : f32
    %201 = vector.broadcast %cst_73 : f32 to vector<16x32xf32>
    %202 = arith.mulf %201, %200 : vector<16x32xf32>
    %cst_74 = arith.constant 4.471500e-02 : f32
    %203 = vector.broadcast %cst_74 : f32 to vector<16x32xf32>
    %204 = arith.mulf %203, %200 : vector<16x32xf32>
    %205 = arith.mulf %204, %200 : vector<16x32xf32>
    %206 = arith.mulf %205, %200 : vector<16x32xf32>
    %207 = arith.addf %200, %206 : vector<16x32xf32>
    %cst_75 = arith.constant 0.797884583 : f32
    %208 = vector.broadcast %cst_75 : f32 to vector<16x32xf32>
    %209 = arith.mulf %208, %207 : vector<16x32xf32>
    %210 = math.tanh %209 : vector<16x32xf32>
    %cst_76 = arith.constant 1.000000e+00 : f32
    %211 = vector.broadcast %cst_76 : f32 to vector<16x32xf32>
    %212 = arith.addf %211, %210 : vector<16x32xf32>
    %213 = arith.mulf %202, %212 : vector<16x32xf32>
    %214 = arith.addf %178, %213 : vector<16x32xf32>
    %cst_77 = arith.constant dense<0.000000e+00> : vector<16xf32>
    %215 = vector.multi_reduction <add>, %214, %cst_77 [1] : vector<16x32xf32> to vector<16xf32>
    %216 = vector.shape_cast %215 : vector<16xf32> to vector<16x1xf32>
    %cst_78 = arith.constant 3.200000e+01 : f32
    %217 = vector.broadcast %cst_78 : f32 to vector<16x1xf32>
    %218 = arith.divf %216, %217 : vector<16x1xf32>
    %219 = vector.broadcast %218 : vector<16x1xf32> to vector<16x32xf32>
    %220 = arith.subf %214, %219 : vector<16x32xf32>
    %221 = arith.mulf %220, %220 : vector<16x32xf32>
    %cst_79 = arith.constant dense<0.000000e+00> : vector<16xf32>
    %222 = vector.multi_reduction <add>, %221, %cst_79 [1] : vector<16x32xf32> to vector<16xf32>
    %223 = vector.shape_cast %222 : vector<16xf32> to vector<16x1xf32>
    %cst_80 = arith.constant 3.200000e+01 : f32
    %224 = vector.broadcast %cst_80 : f32 to vector<16x1xf32>
    %225 = arith.divf %223, %224 : vector<16x1xf32>
    %226 = vector.broadcast %218 : vector<16x1xf32> to vector<16x32xf32>
    %227 = arith.subf %214, %226 : vector<16x32xf32>
    %cst_81 = arith.constant 9.99999974E-6 : f32
    %228 = vector.broadcast %cst_81 : f32 to vector<16x1xf32>
    %229 = arith.addf %225, %228 : vector<16x1xf32>
    %230 = math.rsqrt %229 : vector<16x1xf32>
    %231 = vector.broadcast %230 : vector<16x1xf32> to vector<16x32xf32>
    %232 = arith.mulf %227, %231 : vector<16x32xf32>
    %233 = vector.broadcast %150 : vector<1x32xf32> to vector<16x32xf32>
    %234 = arith.mulf %232, %233 : vector<16x32xf32>
    %235 = vector.broadcast %151 : vector<1x32xf32> to vector<16x32xf32>
    %236 = arith.addf %234, %235 : vector<16x32xf32>
    %237 = vector.shape_cast %236 : vector<16x32xf32> to vector<2x8x32xf32>
    %c0_82 = arith.constant 0 : index
    %c0_83 = arith.constant 0 : index
    %c0_84 = arith.constant 0 : index
    %238 = vector.load %arg8[%c0_82, %c0_83, %c0_84] : memref<2x8x32xf32, #tpu.memory_space<vmem>>, vector<2x8x32xf32>
    tpu.vector_store %arg8[%c0_82, %c0_83, %c0_84], %237 {strides = array<i32>} : memref<2x8x32xf32, #tpu.memory_space<vmem>>, vector<2x8x32xf32>,
    return
  }
}

</mosaic_0001>

<bundles_post_ra>
// kernel: encoder.1
= control target key start
LH: loop header
LB: loop body
LE: loop exit
PB: predicated region body
PF: predicated region fallthrough
CT: control target
= control target key end

     0   :  { %vm43_vm0 = vcmask 261120   ;;  %s4469_s0 = inlined_call_operand.vmem [shape: f32[2,8,32], index: 0, kind: input, shape index: {}]   ;;  %s4470_s1 = inlined_call_operand.vmem [shape: f32[32,96], index: 1, kind: input, shape index: {}]   ;;  %s4471_s2 = inlined_call_operand.vmem [shape: f32[1,96], index: 2, kind: input, shape index: {}]   ;;  %s4472_s3 = inlined_call_operand.vmem [shape: f32[32,32], index: 3, kind: input, shape index: {}]   ;;  %s4473_s4 = inlined_call_operand.vmem [shape: f32[32,128], index: 4, kind: input, shape index: {}]   ;;  %s4474_s5 = inlined_call_operand.vmem [shape: f32[1,128], index: 5, kind: input, shape index: {}]   ;;  %s4475_s6 = inlined_call_operand.vmem [shape: f32[128,32], index: 6, kind: input, shape index: {}]   ;;  %s4476_s7 = inlined_call_operand.vmem [shape: f32[6,32], index: 7, kind: input, shape index: {}]   ;;  %s4477_s8 = inlined_call_operand.hbm [shape: f32[2,8,32], index: 8, kind: output, shape index: {}]  }
   0x1   :  { %v32_v0 = vld [vmem:[%s4470_s1] sm:$0xff]  ;;  %v33_v1 = vld [vmem:[%s4470_s1 + $0x8] sm:$0xff]  ;;  %v34_v2 = vld [vmem:[%s4470_s1 + $0x10] sm:$0xff] }
   0x2   :  { %v3791_v3 = vpack.c.bf16 %v33_v1, %v32_v0  ;;  %v35_v4 = vld [vmem:[%s4470_s1 + $0x18] sm:$0xff]  ;;  %v30_v5 = vld [vmem:[%s4469_s0] sm:$0xff] }
   0x3   :  { %v3795_v6 = vpack.c.bf16 %v35_v4, %v34_v2  ;;  %3571 = vmatprep.mubr.msk.f32.mxu1 %vm43_vm0, %v30_v5 }
   0x4   :  { %13 = vsyncpa [#allocation3], 0  ;;  %3792 = vmatprep.subr.bf16.mxu1 %v3791_v3  ;;  %v31_v7 = vld [vmem:[%s4469_s0 + $0x8] sm:$0xff]  ;;  %v3987_v8 = vmov 0.0   ;;  %vm3988_vm1 = vmmov 0   ;;  %s3989_s18 = smov 64  }
   0x5   :  { %3794 = vmatpush3.bf16.msra.mxu1 %v3791_v3  ;;  %3584 = vmatprep.subr.mxu0 %v3987_v8  ;;  %v3401_v9 = vld [vmem:[%s4471_s2] ss:$0 sm:$0xff]  ;;  %s3990_s19 = smov 96   ;;  %s3991_s20 = smov 92   ;;  %vm128_vm2 = vcmask 31744   ;;  %vm282_vm3 = vcmask 64512  }
   0x6   :  { %3796 = vmatprep.subr.bf16.mxu1 %v3795_v6  ;;  %3586 = vmatprep.mubr.msk.f32.mxu0 %vm3988_vm1, %v3987_v8  ;;  %s3992_s2 = smov 124   ;;  %s3993_s21 = smov 60   ;;  %vm2969_vm4 = vcmask 97280   ;;  %vm2972_vm5 = vcmask 130048   ;;  %vm2975_vm6 = vcmask 162816   ;;  %vm2978_vm7 = vcmask 195584  }
   0x7   :  { %s3994_s22 = smov 88   ;;  %s3995_s23 = smov 120   ;;  %vm2981_vm8 = vcmask 228352  }
   0x8   :  { %s3996_s24 = smov 56   ;;  %s3997_s25 = smov 84  }
   0x9   :  { %3798 = vmatpush3.bf16.msra.mxu1 %v3795_v6  ;;  %s3998_s26 = smov 116   ;;  %s3999_s27 = smov 52  }
   0xa   :  { %3574 = vmatprep.subr.mxu1 %v3987_v8  ;;  %s4000_s28 = smov 80   ;;  %s4001_s29 = smov 112  }
   0xb   :  { %s4002_s30 = smov 48   ;;  %s4003_s9 = smov 76  }
   0xc   :  { %3572 = vmatmul.mubr.msk.f32.vlgmr.msra.gmra.mrb[0].mxu1 %vm43_vm0, %v31_v7  ;;  %s4004_s10 = smov 108   ;;  %s4005_s11 = smov 44  }
   0xd   :  { %3576 = vmatprep.mubr.msk.f32.mxu1 %vm3988_vm1, %v3987_v8  ;;  %s4006_s12 = smov 72   ;;  %s4007_s13 = smov 104  }
   0xe   :  { %s4008_s14 = smov 40   ;;  %s4009_s15 = smov 68  }
   0xf   :  { %s4010_s16 = smov 100   ;;  %s4011_s1 = smov 36  }
  0x10   :  { %s4012_s17 = smov 4  }
  0xdf   :  { %v3573_v10 = vpop.f32.mrb[0].mxu1 }
  0xe0   :  { %v116_v11 = vpop.f32.mrb[1].mxu1  ;;  %v4099_v13 = vadd.f32 %v3573_v10, %v3401_v9 }
  0xe1   :  { %v4095_v12 = vadd.f32 %v3401_v9, %v116_v11 }
  0xe3   :  { %321 = vrot.lane.b32.xlu1 %v4095_v12, %s3989_s18  ;;  %126 = vrot.lane.b32.xlu0 %v4095_v12, %s3990_s19 }
  0xe7   :  { %397 = vrot.lane.b32.xlu1 %v4099_v13, %s3989_s18  ;;  %204 = vrot.lane.b32.xlu0 %v4099_v13, %s3990_s19  ;;  %s4013_s18 = smov 8   ;;  %s4014_s19 = smov 12  }
  0xeb   :  { %553 = vrot.lane.b32.xlu1 %v4099_v13, %s3991_s20  ;;  %475 = vrot.lane.b32.xlu0 %v4095_v12, %s3991_s20  ;;  %s4015_s20 = smov 16  }
  0xef   :  { %551 = vrot.lane.b32.xlu1 %v4099_v13, %s3992_s2  ;;  %473 = vrot.lane.b32.xlu0 %v4095_v12, %s3992_s2  ;;  %s4016_s2 = smov 20  }
  0xf3   :  { %745 = vrot.lane.b32.xlu1 %v4099_v13, %s3993_s21  ;;  %669 = vrot.lane.b32.xlu0 %v4095_v12, %s3993_s21  ;;  %s4017_s21 = smov 24  }
  0xf7   :  { %901 = vrot.lane.b32.xlu1 %v4099_v13, %s3994_s22  ;;  %823 = vrot.lane.b32.xlu0 %v4095_v12, %s3994_s22 }
  0xfb   :  { %899 = vrot.lane.b32.xlu1 %v4099_v13, %s3995_s23  ;;  %821 = vrot.lane.b32.xlu0 %v4095_v12, %s3995_s23 }
  0xff   :  { %1093 = vrot.lane.b32.xlu1 %v4099_v13, %s3996_s24  ;;  %1017 = vrot.lane.b32.xlu0 %v4095_v12, %s3996_s24 }
 0x103   :  { %1249 = vrot.lane.b32.xlu1 %v4099_v13, %s3997_s25  ;;  %1171 = vrot.lane.b32.xlu0 %v4095_v12, %s3997_s25 }
 0x107   :  { %1247 = vrot.lane.b32.xlu1 %v4099_v13, %s3998_s26  ;;  %1169 = vrot.lane.b32.xlu0 %v4095_v12, %s3998_s26 }
 0x10b   :  { %1441 = vrot.lane.b32.xlu1 %v4099_v13, %s3999_s27  ;;  %1365 = vrot.lane.b32.xlu0 %v4095_v12, %s3999_s27 }
 0x10f   :  { %1597 = vrot.lane.b32.xlu1 %v4099_v13, %s4000_s28  ;;  %1519 = vrot.lane.b32.xlu0 %v4095_v12, %s4000_s28 }
 0x113   :  { %1595 = vrot.lane.b32.xlu1 %v4099_v13, %s4001_s29  ;;  %1517 = vrot.lane.b32.xlu0 %v4095_v12, %s4001_s29 }
 0x117   :  { %1789 = vrot.lane.b32.xlu1 %v4099_v13, %s4002_s30  ;;  %1713 = vrot.lane.b32.xlu0 %v4095_v12, %s4002_s30  ;;  %s4018_s30 = smov 28  }
 0x11b   :  { %1945 = vrot.lane.b32.xlu1 %v4099_v13, %s4003_s9  ;;  %1867 = vrot.lane.b32.xlu0 %v4095_v12, %s4003_s9 }
 0x11f   :  { %1943 = vrot.lane.b32.xlu1 %v4099_v13, %s4004_s10  ;;  %1865 = vrot.lane.b32.xlu0 %v4095_v12, %s4004_s10 }
 0x123   :  { %2137 = vrot.lane.b32.xlu1 %v4099_v13, %s4005_s11  ;;  %2061 = vrot.lane.b32.xlu0 %v4095_v12, %s4005_s11 }
 0x127   :  { %2293 = vrot.lane.b32.xlu1 %v4099_v13, %s4006_s12  ;;  %2215 = vrot.lane.b32.xlu0 %v4095_v12, %s4006_s12  ;;  %s4019_s12 = smov [#allocation2]  }
 0x12b   :  { %2291 = vrot.lane.b32.xlu1 %v4099_v13, %s4007_s13  ;;  %2213 = vrot.lane.b32.xlu0 %v4095_v12, %s4007_s13  ;;  %s3390_s13 = sshll.u32 %s4019_s12, 4  ;;  %s3391_s13 = int_to_ptr.vmem [resolvable:$true] %s3390_s13 }
 0x12c   :  { %p3968_p1 = scmp.lt.s32.totalorder %s3391_s13, %s3391_s13 }
 0x12f   :  { %2485 = vrot.lane.b32.xlu1 %v4099_v13, %s4008_s14  ;;  %2409 = vrot.lane.b32.xlu0 %v4095_v12, %s4008_s14 }
 0x133   :  { %2641 = vrot.lane.b32.xlu1 %v4099_v13, %s4009_s15  ;;  %2563 = vrot.lane.b32.xlu0 %v4095_v12, %s4009_s15 }
 0x137   :  { %2639 = vrot.lane.b32.xlu1 %v4099_v13, %s4010_s16  ;;  %2561 = vrot.lane.b32.xlu0 %v4095_v12, %s4010_s16 }
 0x13b   :  { %2833 = vrot.lane.b32.xlu1 %v4099_v13, %s4011_s1  ;;  %2757 = vrot.lane.b32.xlu0 %v4095_v12, %s4011_s1 }
 0x155   :  { %v322_v14 = vpop.permute.xlu1 %321  ;;  %v127_v15 = vpop.permute.xlu0 %126 }
 0x156   :  { %3575 = vmatpush3.xpose.msk.msra.mxu1 %vm128_vm2, %v127_v15  ;;  %3585 = vmatpush3.msra.mxu0 %v322_v14 }
 0x157   :  { %3579 = vmatprep.subr.mxu1 %v3987_v8  ;;  %3594 = vmatprep.subr.mxu0 %v3987_v8 }
 0x159   :  { %3577 = vmatmul.mubr.msk.f32.vlgmr.msra.gmra.mrb[2].mxu1 %vm128_vm2, %v4095_v12  ;;  %v205_v16 = vpop.permute.xlu0 %204  ;;  %v398_v17 = vpop.permute.xlu1 %397 }
 0x15a   :  { %3580 = vmatpush3.xpose.msk.msra.mxu1 %vm128_vm2, %v205_v16  ;;  %3581 = vmatprep.mubr.msk.f32.mxu1 %vm3988_vm1, %v3987_v8 }
 0x15b   :  { %3589 = vmatprep.subr.mxu1 %v3987_v8 }
 0x15d   :  { %3582 = vmatmul.mubr.msk.f32.vlgmr.msra.gmra.mrb[4].mxu1 %vm128_vm2, %v4099_v13  ;;  %v476_v58 = vpop.permute.xlu0 %475  ;;  %v554_v59 = vpop.permute.xlu1 %553 }
 0x15e   :  { %3590 = vmatpush3.msra.mxu1 %v398_v17  ;;  %3591 = vmatprep.mubr.msk.f32.mxu1 %vm3988_vm1, %v3987_v8 }
 0x15f   :  { %3599 = vmatprep.subr.mxu1 %v3987_v8 }
 0x161   :  { %v474_v61 = vpop.permute.xlu0 %473  ;;  %v552_v0 = vpop.permute.xlu1 %551 }
 0x165   :  { %v670_v2 = vpop.permute.xlu0 %669  ;;  %v746_v3 = vpop.permute.xlu1 %745 }
 0x22c   :  { %v199_v18 = vpop.f32.mrb[2].mxu1 }
 0x22d   :  { %v280_v19 = vmul.f32 0.5, %v199_v18  ;;  %v3578_v20 = vpop.f32.mrb[3].mxu1 }
 0x22f   :  { %v283_v21 = vsel %vm282_vm3, %v280_v19, -inf }
 0x230   :  { %v284_v22 = vrot.slane %v283_v21, 4  ;;  %v276_v23 = vpop.f32.mrb[4].mxu1 }
 0x231   :  { %v281_v24 = vmul.f32 0.5, %v276_v23  ;;  %v3583_v25 = vpop.f32.mrb[5].mxu1 }
 0x232   :  { %v285_v26 = vmax.f32 %v283_v21, %v284_v22 }
 0x233   :  { %v290_v27 = vsel %vm282_vm3, %v281_v24, -inf }
 0x234   :  { %v286_v28 = vrot.slane %v285_v26, 2  ;;  %v291_v29 = vrot.slane %v290_v27, 4 }
 0x236   :  { %v287_v30 = vmax.f32 %v285_v26, %v286_v28  ;;  %v292_v31 = vmax.f32 %v290_v27, %v291_v29 }
 0x238   :  { %v288_v32 = vrot.slane %v287_v30, 1  ;;  %v293_v33 = vrot.slane %v292_v31, 2 }
 0x23a   :  { %v289_v34 = vmax.f32 %v287_v30, %v288_v32  ;;  %v294_v35 = vmax.f32 %v292_v31, %v293_v33 }
 0x23c   :  { %v297_v36 = vsub.f32 %v280_v19, %v289_v34  ;;  %v295_v37 = vrot.slane %v294_v35, 1 }
 0x23e   :  { %v299_v38 = vmul.f32 1.442695, %v297_v36  ;;  %v296_v39 = vmax.f32 %v294_v35, %v295_v37 }
 0x240   :  { %3881 = vpow2.f32 %v299_v38  ;;  %v298_v40 = vsub.f32 %v281_v24, %v296_v39 }
 0x242   :  { %v301_v41 = vmul.f32 1.442695, %v298_v40 }
 0x244   :  { %3883 = vpow2.f32 %v301_v41 }
 0x24a   :  { %v3882_v42 = vpop.eup %3881 }
 0x24b   :  { %v303_v43 = vsel %vm282_vm3, %v3882_v42, 0.0 }
 0x24c   :  { %v304_v44 = vrot.slane %v303_v43, 4 }
 0x24e   :  { %v3884_v45 = vpop.eup %3883  ;;  %v305_v46 = vadd.f32 %v304_v44, %v303_v43 }
 0x24f   :  { %v310_v47 = vsel %vm282_vm3, %v3884_v45, 0.0 }
 0x250   :  { %v306_v48 = vrot.slane %v305_v46, 2  ;;  %v311_v49 = vrot.slane %v310_v47, 4 }
 0x252   :  { %v307_v50 = vadd.f32 %v306_v48, %v305_v46  ;;  %v312_v51 = vadd.f32 %v311_v49, %v310_v47  ;;  %v824_v49 = vpop.permute.xlu0 %823 }
 0x254   :  { %v308_v52 = vrot.slane %v307_v50, 1  ;;  %v313_v53 = vrot.slane %v312_v51, 2 }
 0x256   :  { %v314_v54 = vadd.f32 %v313_v53, %v312_v51  ;;  %v309_v55 = vadd.f32 %v308_v52, %v307_v50  ;;  %v902_v50 = vpop.permute.xlu1 %901  ;;  %v822_v52 = vpop.permute.xlu0 %821 }
 0x258   :  { %v315_v56 = vrot.slane %v314_v54, 1  ;;  %3885 = vrcp.f32 %v309_v55 }
 0x25a   :  { %v316_v57 = vadd.f32 %v315_v56, %v314_v54  ;;  %v900_v55 = vpop.permute.xlu1 %899 }
 0x25c   :  { %3887 = vrcp.f32 %v316_v57  ;;  %v1018_v57 = vpop.permute.xlu0 %1017 }
 0x262   :  { %v3886_v60 = vpop.eup %3885 }
 0x263   :  { %v319_v62 = vmul.f32 %v3886_v60, %v3882_v42 }
 0x265   :  { %3587 = vmatmul.mubr.msk.f32.vlgmr.msra.gmra.mrb[0].mxu0 %vm282_vm3, %v319_v62 }
 0x266   :  { %v3888_v63 = vpop.eup %3887  ;;  %3595 = vmatpush3.xpose.msk.msra.mxu0 %vm128_vm2, %v476_v58  ;;  %3596 = vmatprep.mubr.msk.f32.mxu0 %vm3988_vm1, %v3987_v8  ;;  %v1094_v58 = vpop.permute.xlu1 %1093 }
 0x267   :  { %3604 = vmatprep.subr.mxu0 %v3987_v8  ;;  %v320_v1 = vmul.f32 %v3888_v63, %v3884_v45 }
 0x269   :  { %3592 = vmatmul.mubr.msk.f32.vlgmr.msra.gmra.mrb[6].mxu1 %vm282_vm3, %v320_v1  ;;  %3597 = vmatmul.mubr.msk.f32.vlgmr.msra.gmra.mrb[2].mxu0 %vm128_vm2, %v474_v61 }
 0x26a   :  { %3600 = vmatpush3.xpose.msk.msra.mxu1 %vm128_vm2, %v554_v59  ;;  %3605 = vmatpush3.msra.mxu0 %v670_v2 }
 0x26b   :  { %3601 = vmatprep.mubr.msk.f32.mxu1 %vm3988_vm1, %v3987_v8  ;;  %3609 = vmatprep.subr.mxu1 %v3987_v8 }
 0x26c   :  { %3606 = vmatprep.mubr.msk.f32.mxu0 %vm3988_vm1, %v3987_v8  ;;  %3614 = vmatprep.subr.mxu0 %v3987_v8 }
 0x26d   :  { %3602 = vmatmul.mubr.msk.f32.vlgmr.msra.gmra.mrb[8].mxu1 %vm128_vm2, %v552_v0 }
 0x26e   :  { %3610 = vmatpush3.msra.mxu1 %v746_v3  ;;  %3611 = vmatprep.mubr.msk.f32.mxu1 %vm3988_vm1, %v3987_v8 }
 0x26f   :  { %3619 = vmatprep.subr.mxu1 %v3987_v8 }
 0x338   :  { %v4181_v4 = vpop.f32.mrb[0].mxu0 }
 0x339   :  { %v3588_v5 = vpop.f32.mrb[1].mxu0 }
 0x33c   :  { %v4183_v6 = vpop.f32.mrb[6].mxu1  ;;  %v547_v7 = vpop.f32.mrb[2].mxu0 }
 0x33d   :  { %v629_v9 = vmul.f32 0.5, %v547_v7  ;;  %v3593_v10 = vpop.f32.mrb[7].mxu1  ;;  %v3598_v11 = vpop.f32.mrb[3].mxu0 }
 0x33f   :  { %v631_v12 = vsel %vm282_vm3, %v629_v9, -inf }
 0x340   :  { %v632_v13 = vrot.slane %v631_v12, 4  ;;  %v625_v14 = vpop.f32.mrb[8].mxu1 }
 0x341   :  { %v630_v15 = vmul.f32 0.5, %v625_v14  ;;  %v3603_v16 = vpop.f32.mrb[9].mxu1 }
 0x342   :  { %v633_v17 = vmax.f32 %v631_v12, %v632_v13 }
 0x343   :  { %v638_v18 = vsel %vm282_vm3, %v630_v15, -inf }
 0x344   :  { %v634_v19 = vrot.slane %v633_v17, 2  ;;  %v639_v20 = vrot.slane %v638_v18, 4 }
 0x346   :  { %v635_v21 = vmax.f32 %v633_v17, %v634_v19  ;;  %v640_v22 = vmax.f32 %v638_v18, %v639_v20 }
 0x348   :  { %v636_v23 = vrot.slane %v635_v21, 1  ;;  %v641_v24 = vrot.slane %v640_v22, 2 }
 0x34a   :  { %v637_v25 = vmax.f32 %v635_v21, %v636_v23  ;;  %v642_v26 = vmax.f32 %v640_v22, %v641_v24 }
 0x34c   :  { %v645_v27 = vsub.f32 %v629_v9, %v637_v25  ;;  %v643_v28 = vrot.slane %v642_v26, 1 }
 0x34e   :  { %v647_v29 = vmul.f32 1.442695, %v645_v27  ;;  %v644_v30 = vmax.f32 %v642_v26, %v643_v28 }
 0x350   :  { %3889 = vpow2.f32 %v647_v29  ;;  %v646_v31 = vsub.f32 %v630_v15, %v644_v30 }
 0x352   :  { %v649_v32 = vmul.f32 1.442695, %v646_v31 }
 0x354   :  { %3891 = vpow2.f32 %v649_v32 }
 0x35a   :  { %v3890_v33 = vpop.eup %3889 }
 0x35b   :  { %v651_v34 = vsel %vm282_vm3, %v3890_v33, 0.0 }
 0x35c   :  { %v652_v35 = vrot.slane %v651_v34, 4 }
 0x35e   :  { %v3892_v36 = vpop.eup %3891  ;;  %v653_v37 = vadd.f32 %v652_v35, %v651_v34 }
 0x35f   :  { %v658_v38 = vsel %vm282_vm3, %v3892_v36, 0.0 }
 0x360   :  { %v654_v39 = vrot.slane %v653_v37, 2  ;;  %v659_v40 = vrot.slane %v658_v38, 4 }
 0x362   :  { %v655_v41 = vadd.f32 %v654_v39, %v653_v37  ;;  %v660_v42 = vadd.f32 %v659_v40, %v658_v38 }
 0x364   :  { %v656_v43 = vrot.slane %v655_v41, 1  ;;  %v661_v44 = vrot.slane %v660_v42, 2 }
 0x366   :  { %v657_v45 = vadd.f32 %v656_v43, %v655_v41  ;;  %v662_v46 = vadd.f32 %v661_v44, %v660_v42  ;;  %v1172_v42 = vpop.permute.xlu0 %1171  ;;  %v1250_v43 = vpop.permute.xlu1 %1249 }
 0x368   :  { %3893 = vrcp.f32 %v657_v45  ;;  %v663_v47 = vrot.slane %v662_v46, 1 }
 0x36a   :  { %v664_v48 = vadd.f32 %v663_v47, %v662_v46  ;;  %v1170_v45 = vpop.permute.xlu0 %1169 }
 0x36c   :  { %3895 = vrcp.f32 %v664_v48  ;;  %v1248_v48 = vpop.permute.xlu1 %1247 }
 0x372   :  { %v3894_v51 = vpop.eup %3893 }
 0x373   :  { %v667_v53 = vmul.f32 %v3894_v51, %v3890_v33  ;;  %v1442_v51 = vpop.permute.xlu1 %1441 }
 0x375   :  { %3607 = vmatmul.mubr.msk.f32.vlgmr.msra.gmra.mrb[4].mxu0 %vm282_vm3, %v667_v53 }
 0x376   :  { %v3896_v54 = vpop.eup %3895  ;;  %3615 = vmatpush3.xpose.msk.msra.mxu0 %vm128_vm2, %v824_v49  ;;  %3616 = vmatprep.mubr.msk.f32.mxu0 %vm3988_vm1, %v3987_v8 }
 0x377   :  { %3624 = vmatprep.subr.mxu0 %v3987_v8  ;;  %v668_v56 = vmul.f32 %v3896_v54, %v3892_v36 }
 0x379   :  { %3612 = vmatmul.mubr.msk.f32.vlgmr.msra.gmra.mrb[10].mxu1 %vm282_vm3, %v668_v56  ;;  %3617 = vmatmul.mubr.msk.f32.vlgmr.msra.gmra.mrb[6].mxu0 %vm128_vm2, %v822_v52 }
 0x37a   :  { %3620 = vmatpush3.xpose.msk.msra.mxu1 %vm128_vm2, %v902_v50  ;;  %3625 = vmatpush3.msra.mxu0 %v1018_v57  ;;  %v1366_v50 = vpop.permute.xlu0 %1365 }
 0x37b   :  { %3621 = vmatprep.mubr.msk.f32.mxu1 %vm3988_vm1, %v3987_v8  ;;  %3629 = vmatprep.subr.mxu1 %v3987_v8 }
 0x37c   :  { %3626 = vmatprep.mubr.msk.f32.mxu0 %vm3988_vm1, %v3987_v8  ;;  %3634 = vmatprep.subr.mxu0 %v3987_v8 }
 0x37d   :  { %3622 = vmatmul.mubr.msk.f32.vlgmr.msra.gmra.mrb[12].mxu1 %vm128_vm2, %v900_v55 }
 0x37e   :  { %3630 = vmatpush3.msra.mxu1 %v1094_v58  ;;  %3631 = vmatprep.mubr.msk.f32.mxu1 %vm3988_vm1, %v3987_v8 }
 0x37f   :  { %3639 = vmatprep.subr.mxu1 %v3987_v8 }
 0x448   :  { %v741_v59 = vpop.f32.mrb[4].mxu0 }
 0x449   :  { %2911 = vrot.lane.b32.xlu0 %v741_v59, %s4012_s17  ;;  %v3608_v60 = vpop.f32.mrb[5].mxu0 }
 0x44c   :  { %v817_v61 = vpop.f32.mrb[10].mxu1  ;;  %v895_v62 = vpop.f32.mrb[6].mxu0 }
 0x44d   :  { %v977_v63 = vmul.f32 0.5, %v895_v62  ;;  %2913 = vrot.lane.b32.xlu1 %v817_v61, %s4012_s17  ;;  %v3613_v0 = vpop.f32.mrb[11].mxu1  ;;  %v3618_v1 = vpop.f32.mrb[7].mxu0 }
 0x44f   :  { %v979_v2 = vsel %vm282_vm3, %v977_v63, -inf }
 0x450   :  { %v980_v3 = vrot.slane %v979_v2, 4  ;;  %v973_v5 = vpop.f32.mrb[12].mxu1 }
 0x451   :  { %v978_v7 = vmul.f32 0.5, %v973_v5  ;;  %v3623_v9 = vpop.f32.mrb[13].mxu1 }
 0x452   :  { %v981_v10 = vmax.f32 %v979_v2, %v980_v3 }
 0x453   :  { %v986_v11 = vsel %vm282_vm3, %v978_v7, -inf }
 0x454   :  { %v982_v12 = vrot.slane %v981_v10, 2  ;;  %v987_v13 = vrot.slane %v986_v11, 4 }
 0x456   :  { %v983_v14 = vmax.f32 %v981_v10, %v982_v12  ;;  %v988_v15 = vmax.f32 %v986_v11, %v987_v13 }
 0x458   :  { %v984_v16 = vrot.slane %v983_v14, 1  ;;  %v989_v17 = vrot.slane %v988_v15, 2 }
 0x45a   :  { %v985_v18 = vmax.f32 %v983_v14, %v984_v16  ;;  %v990_v19 = vmax.f32 %v988_v15, %v989_v17 }
 0x45c   :  { %v993_v20 = vsub.f32 %v977_v63, %v985_v18  ;;  %v991_v21 = vrot.slane %v990_v19, 1 }
 0x45e   :  { %v995_v22 = vmul.f32 1.442695, %v993_v20  ;;  %v992_v23 = vmax.f32 %v990_v19, %v991_v21 }
 0x460   :  { %3897 = vpow2.f32 %v995_v22  ;;  %v994_v24 = vsub.f32 %v978_v7, %v992_v23 }
 0x462   :  { %v997_v25 = vmul.f32 1.442695, %v994_v24 }
 0x464   :  { %3899 = vpow2.f32 %v997_v25 }
 0x46a   :  { %v3898_v26 = vpop.eup %3897 }
 0x46b   :  { %v999_v27 = vsel %vm282_vm3, %v3898_v26, 0.0 }
 0x46c   :  { %v1000_v28 = vrot.slane %v999_v27, 4 }
 0x46e   :  { %v3900_v29 = vpop.eup %3899  ;;  %v1001_v30 = vadd.f32 %v1000_v28, %v999_v27 }
 0x46f   :  { %v1006_v31 = vsel %vm282_vm3, %v3900_v29, 0.0 }
 0x470   :  { %v1002_v32 = vrot.slane %v1001_v30, 2  ;;  %v1007_v33 = vrot.slane %v1006_v31, 4 }
 0x472   :  { %v1003_v34 = vadd.f32 %v1002_v32, %v1001_v30  ;;  %v1008_v35 = vadd.f32 %v1007_v33, %v1006_v31 }
 0x474   :  { %v1004_v36 = vrot.slane %v1003_v34, 1  ;;  %v1009_v37 = vrot.slane %v1008_v35, 2 }
 0x476   :  { %v1005_v38 = vadd.f32 %v1004_v36, %v1003_v34  ;;  %v1010_v39 = vadd.f32 %v1009_v37, %v1008_v35  ;;  %v1520_v35 = vpop.permute.xlu0 %1519  ;;  %v1598_v36 = vpop.permute.xlu1 %1597 }
 0x478   :  { %3901 = vrcp.f32 %v1005_v38  ;;  %v1011_v40 = vrot.slane %v1010_v39, 1 }
 0x47a   :  { %v1012_v41 = vadd.f32 %v1011_v40, %v1010_v39  ;;  %v1518_v38 = vpop.permute.xlu0 %1517 }
 0x47c   :  { %3903 = vrcp.f32 %v1012_v41  ;;  %v1596_v41 = vpop.permute.xlu1 %1595 }
 0x482   :  { %v3902_v44 = vpop.eup %3901 }
 0x483   :  { %v1015_v46 = vmul.f32 %v3902_v44, %v3898_v26  ;;  %v1790_v44 = vpop.permute.xlu1 %1789 }
 0x485   :  { %3627 = vmatmul.mubr.msk.f32.vlgmr.msra.gmra.mrb[8].mxu0 %vm282_vm3, %v1015_v46 }
 0x486   :  { %v3904_v47 = vpop.eup %3903  ;;  %3635 = vmatpush3.xpose.msk.msra.mxu0 %vm128_vm2, %v1172_v42  ;;  %3636 = vmatprep.mubr.msk.f32.mxu0 %vm3988_vm1, %v3987_v8 }
 0x487   :  { %3644 = vmatprep.subr.mxu0 %v3987_v8  ;;  %v1016_v49 = vmul.f32 %v3904_v47, %v3900_v29 }
 0x489   :  { %3632 = vmatmul.mubr.msk.f32.vlgmr.msra.gmra.mrb[14].mxu1 %vm282_vm3, %v1016_v49  ;;  %3637 = vmatmul.mubr.msk.f32.vlgmr.msra.gmra.mrb[10].mxu0 %vm128_vm2, %v1170_v45 }
 0x48a   :  { %3640 = vmatpush3.xpose.msk.msra.mxu1 %vm128_vm2, %v1250_v43  ;;  %3645 = vmatpush3.msra.mxu0 %v1366_v50  ;;  %v1714_v43 = vpop.permute.xlu0 %1713 }
 0x48b   :  { %3641 = vmatprep.mubr.msk.f32.mxu1 %vm3988_vm1, %v3987_v8  ;;  %3649 = vmatprep.subr.mxu1 %v3987_v8 }
 0x48c   :  { %3646 = vmatprep.mubr.msk.f32.mxu0 %vm3988_vm1, %v3987_v8  ;;  %3654 = vmatprep.subr.mxu0 %v3987_v8 }
 0x48d   :  { %3642 = vmatmul.mubr.msk.f32.vlgmr.msra.gmra.mrb[16].mxu1 %vm128_vm2, %v1248_v48 }
 0x48e   :  { %3650 = vmatpush3.msra.mxu1 %v1442_v51  ;;  %3651 = vmatprep.mubr.msk.f32.mxu1 %vm3988_vm1, %v3987_v8 }
 0x48f   :  { %3659 = vmatprep.subr.mxu1 %v3987_v8 }
 0x558   :  { %v1089_v52 = vpop.f32.mrb[8].mxu0 }
 0x559   :  { %2919 = vrot.lane.b32.xlu0 %v1089_v52, %s4013_s18  ;;  %v3628_v53 = vpop.f32.mrb[9].mxu0 }
 0x55c   :  { %v1165_v54 = vpop.f32.mrb[14].mxu1  ;;  %v1243_v55 = vpop.f32.mrb[10].mxu0 }
 0x55d   :  { %v1325_v56 = vmul.f32 0.5, %v1243_v55  ;;  %2921 = vrot.lane.b32.xlu1 %v1165_v54, %s4013_s18  ;;  %v3633_v57 = vpop.f32.mrb[15].mxu1  ;;  %v3638_v58 = vpop.f32.mrb[11].mxu0 }
 0x55f   :  { %v1327_v59 = vsel %vm282_vm3, %v1325_v56, -inf }
 0x560   :  { %v1328_v60 = vrot.slane %v1327_v59, 4  ;;  %v1321_v61 = vpop.f32.mrb[16].mxu1 }
 0x561   :  { %v1326_v62 = vmul.f32 0.5, %v1321_v61  ;;  %v3643_v63 = vpop.f32.mrb[17].mxu1 }
 0x562   :  { %v1329_v0 = vmax.f32 %v1327_v59, %v1328_v60 }
 0x563   :  { %v1334_v1 = vsel %vm282_vm3, %v1326_v62, -inf }
 0x564   :  { %v1330_v2 = vrot.slane %v1329_v0, 2  ;;  %v1335_v3 = vrot.slane %v1334_v1, 4 }
 0x566   :  { %v1331_v5 = vmax.f32 %v1329_v0, %v1330_v2  ;;  %v1336_v7 = vmax.f32 %v1334_v1, %v1335_v3 }
 0x568   :  { %v1332_v9 = vrot.slane %v1331_v5, 1  ;;  %v1337_v10 = vrot.slane %v1336_v7, 2 }
 0x56a   :  { %v1333_v11 = vmax.f32 %v1331_v5, %v1332_v9  ;;  %v1338_v12 = vmax.f32 %v1336_v7, %v1337_v10 }
 0x56c   :  { %v1341_v13 = vsub.f32 %v1325_v56, %v1333_v11  ;;  %v1339_v14 = vrot.slane %v1338_v12, 1 }
 0x56e   :  { %v1343_v15 = vmul.f32 1.442695, %v1341_v13  ;;  %v1340_v16 = vmax.f32 %v1338_v12, %v1339_v14 }
 0x570   :  { %3905 = vpow2.f32 %v1343_v15  ;;  %v1342_v17 = vsub.f32 %v1326_v62, %v1340_v16 }
 0x572   :  { %v1345_v18 = vmul.f32 1.442695, %v1342_v17 }
 0x574   :  { %3907 = vpow2.f32 %v1345_v18 }
 0x57a   :  { %v3906_v19 = vpop.eup %3905 }
 0x57b   :  { %v1347_v20 = vsel %vm282_vm3, %v3906_v19, 0.0 }
 0x57c   :  { %v1348_v21 = vrot.slane %v1347_v20, 4 }
 0x57e   :  { %v3908_v22 = vpop.eup %3907  ;;  %v1349_v23 = vadd.f32 %v1348_v21, %v1347_v20 }
 0x57f   :  { %v1354_v24 = vsel %vm282_vm3, %v3908_v22, 0.0 }
 0x580   :  { %v1350_v25 = vrot.slane %v1349_v23, 2  ;;  %v1355_v26 = vrot.slane %v1354_v24, 4 }
 0x582   :  { %v1351_v27 = vadd.f32 %v1350_v25, %v1349_v23  ;;  %v1356_v28 = vadd.f32 %v1355_v26, %v1354_v24 }
 0x584   :  { %v1352_v29 = vrot.slane %v1351_v27, 1  ;;  %v1357_v30 = vrot.slane %v1356_v28, 2 }
 0x586   :  { %v1353_v31 = vadd.f32 %v1352_v29, %v1351_v27  ;;  %v1358_v32 = vadd.f32 %v1357_v30, %v1356_v28  ;;  %v1868_v28 = vpop.permute.xlu0 %1867  ;;  %v1946_v29 = vpop.permute.xlu1 %1945 }
 0x588   :  { %3909 = vrcp.f32 %v1353_v31  ;;  %v1359_v33 = vrot.slane %v1358_v32, 1 }
 0x58a   :  { %v1360_v34 = vadd.f32 %v1359_v33, %v1358_v32  ;;  %v1866_v31 = vpop.permute.xlu0 %1865 }
 0x58c   :  { %3911 = vrcp.f32 %v1360_v34  ;;  %v1944_v34 = vpop.permute.xlu1 %1943 }
 0x592   :  { %v3910_v37 = vpop.eup %3909 }
 0x593   :  { %v1363_v39 = vmul.f32 %v3910_v37, %v3906_v19  ;;  %v2138_v37 = vpop.permute.xlu1 %2137 }
 0x595   :  { %3647 = vmatmul.mubr.msk.f32.vlgmr.msra.gmra.mrb[12].mxu0 %vm282_vm3, %v1363_v39 }
 0x596   :  { %v3912_v40 = vpop.eup %3911  ;;  %3655 = vmatpush3.xpose.msk.msra.mxu0 %vm128_vm2, %v1520_v35  ;;  %3656 = vmatprep.mubr.msk.f32.mxu0 %vm3988_vm1, %v3987_v8 }
 0x597   :  { %3664 = vmatprep.subr.mxu0 %v3987_v8  ;;  %v1364_v42 = vmul.f32 %v3912_v40, %v3908_v22 }
 0x599   :  { %3652 = vmatmul.mubr.msk.f32.vlgmr.msra.gmra.mrb[18].mxu1 %vm282_vm3, %v1364_v42  ;;  %3657 = vmatmul.mubr.msk.f32.vlgmr.msra.gmra.mrb[14].mxu0 %vm128_vm2, %v1518_v38 }
 0x59a   :  { %3660 = vmatpush3.xpose.msk.msra.mxu1 %vm128_vm2, %v1598_v36  ;;  %3665 = vmatpush3.msra.mxu0 %v1714_v43  ;;  %v2062_v36 = vpop.permute.xlu0 %2061 }
 0x59b   :  { %3661 = vmatprep.mubr.msk.f32.mxu1 %vm3988_vm1, %v3987_v8  ;;  %3669 = vmatprep.subr.mxu1 %v3987_v8 }
 0x59c   :  { %3666 = vmatprep.mubr.msk.f32.mxu0 %vm3988_vm1, %v3987_v8  ;;  %3674 = vmatprep.subr.mxu0 %v3987_v8 }
 0x59d   :  { %3662 = vmatmul.mubr.msk.f32.vlgmr.msra.gmra.mrb[20].mxu1 %vm128_vm2, %v1596_v41 }
 0x59e   :  { %3670 = vmatpush3.msra.mxu1 %v1790_v44  ;;  %3671 = vmatprep.mubr.msk.f32.mxu1 %vm3988_vm1, %v3987_v8 }
 0x59f   :  { %3679 = vmatprep.subr.mxu1 %v3987_v8 }
 0x668   :  { %v1437_v45 = vpop.f32.mrb[12].mxu0 }
 0x669   :  { %2927 = vrot.lane.b32.xlu0 %v1437_v45, %s4014_s19  ;;  %v3648_v46 = vpop.f32.mrb[13].mxu0 }
 0x66c   :  { %v1513_v47 = vpop.f32.mrb[18].mxu1  ;;  %v1591_v48 = vpop.f32.mrb[14].mxu0 }
 0x66d   :  { %v1673_v49 = vmul.f32 0.5, %v1591_v48  ;;  %2929 = vrot.lane.b32.xlu1 %v1513_v47, %s4014_s19  ;;  %v3653_v50 = vpop.f32.mrb[19].mxu1  ;;  %v3658_v51 = vpop.f32.mrb[15].mxu0 }
 0x66f   :  { %v1675_v52 = vsel %vm282_vm3, %v1673_v49, -inf }
 0x670   :  { %v1676_v53 = vrot.slane %v1675_v52, 4  ;;  %v1669_v54 = vpop.f32.mrb[20].mxu1 }
 0x671   :  { %v1674_v55 = vmul.f32 0.5, %v1669_v54  ;;  %v3663_v56 = vpop.f32.mrb[21].mxu1 }
 0x672   :  { %v1677_v57 = vmax.f32 %v1675_v52, %v1676_v53 }
 0x673   :  { %v1682_v58 = vsel %vm282_vm3, %v1674_v55, -inf }
 0x674   :  { %v1678_v59 = vrot.slane %v1677_v57, 2  ;;  %v1683_v60 = vrot.slane %v1682_v58, 4 }
 0x676   :  { %v1679_v61 = vmax.f32 %v1677_v57, %v1678_v59  ;;  %v1684_v62 = vmax.f32 %v1682_v58, %v1683_v60 }
 0x678   :  { %v1680_v63 = vrot.slane %v1679_v61, 1  ;;  %v1685_v0 = vrot.slane %v1684_v62, 2 }
 0x67a   :  { %v1681_v1 = vmax.f32 %v1679_v61, %v1680_v63  ;;  %v1686_v2 = vmax.f32 %v1684_v62, %v1685_v0 }
 0x67c   :  { %v1689_v3 = vsub.f32 %v1673_v49, %v1681_v1  ;;  %v1687_v5 = vrot.slane %v1686_v2, 1 }
 0x67e   :  { %v1691_v7 = vmul.f32 1.442695, %v1689_v3  ;;  %v1688_v9 = vmax.f32 %v1686_v2, %v1687_v5 }
 0x680   :  { %3913 = vpow2.f32 %v1691_v7  ;;  %v1690_v10 = vsub.f32 %v1674_v55, %v1688_v9 }
 0x682   :  { %v1693_v11 = vmul.f32 1.442695, %v1690_v10 }
 0x684   :  { %3915 = vpow2.f32 %v1693_v11 }
 0x68a   :  { %v3914_v12 = vpop.eup %3913 }
 0x68b   :  { %v1695_v13 = vsel %vm282_vm3, %v3914_v12, 0.0 }
 0x68c   :  { %v1696_v14 = vrot.slane %v1695_v13, 4 }
 0x68e   :  { %v3916_v15 = vpop.eup %3915  ;;  %v1697_v16 = vadd.f32 %v1696_v14, %v1695_v13 }
 0x68f   :  { %v1702_v17 = vsel %vm282_vm3, %v3916_v15, 0.0 }
 0x690   :  { %v1698_v18 = vrot.slane %v1697_v16, 2  ;;  %v1703_v19 = vrot.slane %v1702_v17, 4 }
 0x692   :  { %v1699_v20 = vadd.f32 %v1698_v18, %v1697_v16  ;;  %v1704_v21 = vadd.f32 %v1703_v19, %v1702_v17 }
 0x694   :  { %v1700_v22 = vrot.slane %v1699_v20, 1  ;;  %v1705_v23 = vrot.slane %v1704_v21, 2 }
 0x696   :  { %v1701_v24 = vadd.f32 %v1700_v22, %v1699_v20  ;;  %v1706_v25 = vadd.f32 %v1705_v23, %v1704_v21  ;;  %v2216_v21 = vpop.permute.xlu0 %2215  ;;  %v2294_v22 = vpop.permute.xlu1 %2293 }
 0x698   :  { %3917 = vrcp.f32 %v1701_v24  ;;  %v1707_v26 = vrot.slane %v1706_v25, 1 }
 0x69a   :  { %v1708_v27 = vadd.f32 %v1707_v26, %v1706_v25  ;;  %v2214_v24 = vpop.permute.xlu0 %2213 }
 0x69c   :  { %3919 = vrcp.f32 %v1708_v27  ;;  %v2292_v27 = vpop.permute.xlu1 %2291 }
 0x6a2   :  { %v3918_v30 = vpop.eup %3917 }
 0x6a3   :  { %v1711_v32 = vmul.f32 %v3918_v30, %v3914_v12  ;;  %v2486_v30 = vpop.permute.xlu1 %2485 }
 0x6a5   :  { %3667 = vmatmul.mubr.msk.f32.vlgmr.msra.gmra.mrb[16].mxu0 %vm282_vm3, %v1711_v32 }
 0x6a6   :  { %v3920_v33 = vpop.eup %3919  ;;  %3675 = vmatpush3.xpose.msk.msra.mxu0 %vm128_vm2, %v1868_v28  ;;  %3676 = vmatprep.mubr.msk.f32.mxu0 %vm3988_vm1, %v3987_v8 }
 0x6a7   :  { %3684 = vmatprep.subr.mxu0 %v3987_v8  ;;  %v1712_v35 = vmul.f32 %v3920_v33, %v3916_v15 }
 0x6a9   :  { %3672 = vmatmul.mubr.msk.f32.vlgmr.msra.gmra.mrb[22].mxu1 %vm282_vm3, %v1712_v35  ;;  %3677 = vmatmul.mubr.msk.f32.vlgmr.msra.gmra.mrb[18].mxu0 %vm128_vm2, %v1866_v31 }
 0x6aa   :  { %3680 = vmatpush3.xpose.msk.msra.mxu1 %vm128_vm2, %v1946_v29  ;;  %3685 = vmatpush3.msra.mxu0 %v2062_v36  ;;  %v2410_v29 = vpop.permute.xlu0 %2409 }
 0x6ab   :  { %3681 = vmatprep.mubr.msk.f32.mxu1 %vm3988_vm1, %v3987_v8  ;;  %3689 = vmatprep.subr.mxu1 %v3987_v8 }
 0x6ac   :  { %3686 = vmatprep.mubr.msk.f32.mxu0 %vm3988_vm1, %v3987_v8  ;;  %3694 = vmatprep.subr.mxu0 %v3987_v8 }
 0x6ad   :  { %3682 = vmatmul.mubr.msk.f32.vlgmr.msra.gmra.mrb[24].mxu1 %vm128_vm2, %v1944_v34 }
 0x6ae   :  { %3690 = vmatpush3.msra.mxu1 %v2138_v37  ;;  %3691 = vmatprep.mubr.msk.f32.mxu1 %vm3988_vm1, %v3987_v8 }
 0x6af   :  { %3699 = vmatprep.subr.mxu1 %v3987_v8 }
 0x778   :  { %v1785_v38 = vpop.f32.mrb[16].mxu0 }
 0x779   :  { %2935 = vrot.lane.b32.xlu0 %v1785_v38, %s4015_s20  ;;  %v3668_v39 = vpop.f32.mrb[17].mxu0 }
 0x77c   :  { %v1861_v40 = vpop.f32.mrb[22].mxu1  ;;  %v1939_v41 = vpop.f32.mrb[18].mxu0 }
 0x77d   :  { %v2021_v42 = vmul.f32 0.5, %v1939_v41  ;;  %2937 = vrot.lane.b32.xlu1 %v1861_v40, %s4015_s20  ;;  %v3673_v43 = vpop.f32.mrb[23].mxu1  ;;  %v3678_v44 = vpop.f32.mrb[19].mxu0 }
 0x77f   :  { %v2023_v45 = vsel %vm282_vm3, %v2021_v42, -inf }
 0x780   :  { %v2024_v46 = vrot.slane %v2023_v45, 4  ;;  %v2017_v47 = vpop.f32.mrb[24].mxu1 }
 0x781   :  { %v2022_v48 = vmul.f32 0.5, %v2017_v47  ;;  %v3683_v49 = vpop.f32.mrb[25].mxu1 }
 0x782   :  { %v2025_v50 = vmax.f32 %v2023_v45, %v2024_v46 }
 0x783   :  { %v2030_v51 = vsel %vm282_vm3, %v2022_v48, -inf }
 0x784   :  { %v2026_v52 = vrot.slane %v2025_v50, 2  ;;  %v2031_v53 = vrot.slane %v2030_v51, 4 }
 0x786   :  { %v2027_v54 = vmax.f32 %v2025_v50, %v2026_v52  ;;  %v2032_v55 = vmax.f32 %v2030_v51, %v2031_v53 }
 0x788   :  { %v2028_v56 = vrot.slane %v2027_v54, 1  ;;  %v2033_v57 = vrot.slane %v2032_v55, 2 }
 0x78a   :  { %v2029_v58 = vmax.f32 %v2027_v54, %v2028_v56  ;;  %v2034_v59 = vmax.f32 %v2032_v55, %v2033_v57 }
 0x78c   :  { %v2037_v60 = vsub.f32 %v2021_v42, %v2029_v58  ;;  %v2035_v61 = vrot.slane %v2034_v59, 1 }
 0x78e   :  { %v2039_v62 = vmul.f32 1.442695, %v2037_v60  ;;  %v2036_v63 = vmax.f32 %v2034_v59, %v2035_v61 }
 0x790   :  { %3921 = vpow2.f32 %v2039_v62  ;;  %v2038_v0 = vsub.f32 %v2022_v48, %v2036_v63 }
 0x792   :  { %v2041_v1 = vmul.f32 1.442695, %v2038_v0 }
 0x794   :  { %3923 = vpow2.f32 %v2041_v1 }
 0x79a   :  { %v3922_v2 = vpop.eup %3921 }
 0x79b   :  { %v2043_v3 = vsel %vm282_vm3, %v3922_v2, 0.0 }
 0x79c   :  { %v2044_v5 = vrot.slane %v2043_v3, 4 }
 0x79e   :  { %v3924_v7 = vpop.eup %3923  ;;  %v2045_v9 = vadd.f32 %v2044_v5, %v2043_v3 }
 0x79f   :  { %v2050_v10 = vsel %vm282_vm3, %v3924_v7, 0.0 }
 0x7a0   :  { %v2046_v11 = vrot.slane %v2045_v9, 2  ;;  %v2051_v12 = vrot.slane %v2050_v10, 4 }
 0x7a2   :  { %v2047_v13 = vadd.f32 %v2046_v11, %v2045_v9  ;;  %v2052_v14 = vadd.f32 %v2051_v12, %v2050_v10 }
 0x7a4   :  { %v2048_v15 = vrot.slane %v2047_v13, 1  ;;  %v2053_v16 = vrot.slane %v2052_v14, 2 }
 0x7a6   :  { %v2049_v17 = vadd.f32 %v2048_v15, %v2047_v13  ;;  %v2054_v18 = vadd.f32 %v2053_v16, %v2052_v14  ;;  %v2564_v14 = vpop.permute.xlu0 %2563  ;;  %v2642_v15 = vpop.permute.xlu1 %2641 }
 0x7a8   :  { %3925 = vrcp.f32 %v2049_v17  ;;  %v2055_v19 = vrot.slane %v2054_v18, 1 }
 0x7aa   :  { %v2056_v20 = vadd.f32 %v2055_v19, %v2054_v18  ;;  %v2562_v17 = vpop.permute.xlu0 %2561 }
 0x7ac   :  { %3927 = vrcp.f32 %v2056_v20  ;;  %v2640_v20 = vpop.permute.xlu1 %2639 }
 0x7b2   :  { %v3926_v23 = vpop.eup %3925 }
 0x7b3   :  { %v2059_v25 = vmul.f32 %v3926_v23, %v3922_v2  ;;  %v2834_v23 = vpop.permute.xlu1 %2833 }
 0x7b5   :  { %3687 = vmatmul.mubr.msk.f32.vlgmr.msra.gmra.mrb[20].mxu0 %vm282_vm3, %v2059_v25 }
 0x7b6   :  { %v3928_v26 = vpop.eup %3927  ;;  %3695 = vmatpush3.xpose.msk.msra.mxu0 %vm128_vm2, %v2216_v21  ;;  %3696 = vmatprep.mubr.msk.f32.mxu0 %vm3988_vm1, %v3987_v8 }
 0x7b7   :  { %3704 = vmatprep.subr.mxu0 %v3987_v8  ;;  %v2060_v28 = vmul.f32 %v3928_v26, %v3924_v7 }
 0x7b9   :  { %3692 = vmatmul.mubr.msk.f32.vlgmr.msra.gmra.mrb[26].mxu1 %vm282_vm3, %v2060_v28  ;;  %3697 = vmatmul.mubr.msk.f32.vlgmr.msra.gmra.mrb[22].mxu0 %vm128_vm2, %v2214_v24 }
 0x7ba   :  { %3700 = vmatpush3.xpose.msk.msra.mxu1 %vm128_vm2, %v2294_v22  ;;  %3705 = vmatpush3.msra.mxu0 %v2410_v29  ;;  %v2758_v22 = vpop.permute.xlu0 %2757 }
 0x7bb   :  { %3701 = vmatprep.mubr.msk.f32.mxu1 %vm3988_vm1, %v3987_v8  ;;  %3709 = vmatprep.subr.mxu1 %v3987_v8 }
 0x7bc   :  { %3706 = vmatprep.mubr.msk.f32.mxu0 %vm3988_vm1, %v3987_v8  ;;  %3714 = vmatprep.subr.mxu0 %v3987_v8 }
 0x7bd   :  { %3702 = vmatmul.mubr.msk.f32.vlgmr.msra.gmra.mrb[28].mxu1 %vm128_vm2, %v2292_v27 }
 0x7be   :  { %3710 = vmatpush3.msra.mxu1 %v2486_v30  ;;  %3711 = vmatprep.mubr.msk.f32.mxu1 %vm3988_vm1, %v3987_v8 }
 0x7bf   :  { %3719 = vmatprep.subr.mxu1 %v3987_v8 }
 0x888   :  { %v2133_v31 = vpop.f32.mrb[20].mxu0 }
 0x889   :  { %2943 = vrot.lane.b32.xlu0 %v2133_v31, %s4016_s2  ;;  %v3688_v32 = vpop.f32.mrb[21].mxu0 }
 0x88c   :  { %v2209_v33 = vpop.f32.mrb[26].mxu1  ;;  %v2287_v34 = vpop.f32.mrb[22].mxu0 }
 0x88d   :  { %v2369_v35 = vmul.f32 0.5, %v2287_v34  ;;  %2945 = vrot.lane.b32.xlu1 %v2209_v33, %s4016_s2  ;;  %v3693_v36 = vpop.f32.mrb[27].mxu1  ;;  %v3698_v37 = vpop.f32.mrb[23].mxu0 }
 0x88f   :  { %v2371_v38 = vsel %vm282_vm3, %v2369_v35, -inf }
 0x890   :  { %v2372_v39 = vrot.slane %v2371_v38, 4  ;;  %v2365_v40 = vpop.f32.mrb[28].mxu1 }
 0x891   :  { %v2370_v41 = vmul.f32 0.5, %v2365_v40  ;;  %v3703_v42 = vpop.f32.mrb[29].mxu1 }
 0x892   :  { %v2373_v43 = vmax.f32 %v2371_v38, %v2372_v39 }
 0x893   :  { %v2378_v44 = vsel %vm282_vm3, %v2370_v41, -inf }
 0x894   :  { %v2374_v45 = vrot.slane %v2373_v43, 2  ;;  %v2379_v46 = vrot.slane %v2378_v44, 4 }
 0x896   :  { %v2375_v47 = vmax.f32 %v2373_v43, %v2374_v45  ;;  %v2380_v48 = vmax.f32 %v2378_v44, %v2379_v46 }
 0x898   :  { %v2376_v49 = vrot.slane %v2375_v47, 1  ;;  %v2381_v50 = vrot.slane %v2380_v48, 2 }
 0x89a   :  { %v2377_v51 = vmax.f32 %v2375_v47, %v2376_v49  ;;  %v2382_v52 = vmax.f32 %v2380_v48, %v2381_v50 }
 0x89c   :  { %v2385_v53 = vsub.f32 %v2369_v35, %v2377_v51  ;;  %v2383_v54 = vrot.slane %v2382_v52, 1 }
 0x89e   :  { %v2387_v55 = vmul.f32 1.442695, %v2385_v53  ;;  %v2384_v56 = vmax.f32 %v2382_v52, %v2383_v54 }
 0x8a0   :  { %3929 = vpow2.f32 %v2387_v55  ;;  %v2386_v57 = vsub.f32 %v2370_v41, %v2384_v56 }
 0x8a2   :  { %v2389_v58 = vmul.f32 1.442695, %v2386_v57 }
 0x8a4   :  { %3931 = vpow2.f32 %v2389_v58 }
 0x8aa   :  { %v3930_v59 = vpop.eup %3929 }
 0x8ab   :  { %v2391_v60 = vsel %vm282_vm3, %v3930_v59, 0.0 }
 0x8ac   :  { %v2392_v61 = vrot.slane %v2391_v60, 4 }
 0x8ae   :  { %v3932_v62 = vpop.eup %3931  ;;  %v2393_v63 = vadd.f32 %v2392_v61, %v2391_v60 }
 0x8af   :  { %v2398_v0 = vsel %vm282_vm3, %v3932_v62, 0.0 }
 0x8b0   :  { %v2394_v1 = vrot.slane %v2393_v63, 2  ;;  %v2399_v2 = vrot.slane %v2398_v0, 4 }
 0x8b2   :  { %v2395_v3 = vadd.f32 %v2394_v1, %v2393_v63  ;;  %v2400_v5 = vadd.f32 %v2399_v2, %v2398_v0 }
 0x8b4   :  { %v2396_v7 = vrot.slane %v2395_v3, 1  ;;  %v2401_v9 = vrot.slane %v2400_v5, 2 }
 0x8b6   :  { %v2397_v10 = vadd.f32 %v2396_v7, %v2395_v3  ;;  %v2402_v11 = vadd.f32 %v2401_v9, %v2400_v5 }
 0x8b8   :  { %3933 = vrcp.f32 %v2397_v10  ;;  %v2403_v12 = vrot.slane %v2402_v11, 1  ;;  %v2990_v10 = vld [vmem:[%s4472_s3] sm:$0xff] }
 0x8ba   :  { %v2404_v13 = vadd.f32 %v2403_v12, %v2402_v11  ;;  %v2991_v11 = vld [vmem:[%s4472_s3 + $0x8] sm:$0xff] }
 0x8bb   :  { %v3799_v12 = vpack.c.bf16 %v2991_v11, %v2990_v10  ;;  %v3230_v11 = vld [vmem:[%s4475_s6] sm:$0xff] }
 0x8bc   :  { %3935 = vrcp.f32 %v2404_v13  ;;  %v2992_v13 = vld [vmem:[%s4472_s3 + $0x10] sm:$0xff] }
 0x8c2   :  { %v3934_v16 = vpop.eup %3933 }
 0x8c3   :  { %v2407_v18 = vmul.f32 %v3934_v16, %v3930_v59 }
 0x8c5   :  { %3707 = vmatmul.mubr.msk.f32.vlgmr.msra.gmra.mrb[24].mxu0 %vm282_vm3, %v2407_v18 }
 0x8c6   :  { %v3936_v19 = vpop.eup %3935  ;;  %3715 = vmatpush3.xpose.msk.msra.mxu0 %vm128_vm2, %v2564_v14  ;;  %3716 = vmatprep.mubr.msk.f32.mxu0 %vm3988_vm1, %v3987_v8  ;;  %v2993_v14 = vld [vmem:[%s4472_s3 + $0x18] sm:$0xff] }
 0x8c7   :  { %3724 = vmatprep.subr.mxu0 %v3987_v8  ;;  %v2408_v21 = vmul.f32 %v3936_v19, %v3932_v62 }
 0x8c9   :  { %3712 = vmatmul.mubr.msk.f32.vlgmr.msra.gmra.mrb[30].mxu1 %vm282_vm3, %v2408_v21  ;;  %3717 = vmatmul.mubr.msk.f32.vlgmr.msra.gmra.mrb[26].mxu0 %vm128_vm2, %v2562_v17  ;;  %v2914_v21 = vpop.permute.xlu1 %2913 }
 0x8ca   :  { %3720 = vmatpush3.xpose.msk.msra.mxu1 %vm128_vm2, %v2642_v15  ;;  %3725 = vmatpush3.msra.mxu0 %v2758_v22  ;;  %v3803_v15 = vpack.c.bf16 %v2993_v14, %v2992_v13 }
 0x8cb   :  { %3721 = vmatprep.mubr.msk.f32.mxu1 %vm3988_vm1, %v3987_v8  ;;  %3729 = vmatprep.subr.mxu1 %v3987_v8 }
 0x8cc   :  { %3726 = vmatprep.mubr.msk.f32.mxu0 %vm3988_vm1, %v3987_v8 }
 0x8cd   :  { %3722 = vmatmul.mubr.msk.f32.vlgmr.msra.gmra.mrb[32].mxu1 %vm128_vm2, %v2640_v20  ;;  %v2912_v20 = vpop.permute.xlu0 %2911 }
 0x8ce   :  { %3730 = vmatpush3.msra.mxu1 %v2834_v23  ;;  %3731 = vmatprep.mubr.msk.f32.mxu1 %vm3988_vm1, %v3987_v8  ;;  %v2922_v23 = vpop.permute.xlu1 %2921 }
 0x8cf   :  { %3800 = vmatprep.subr.bf16.mxu1 %v3799_v12 }
 0x8d1   :  { %v2920_v22 = vpop.permute.xlu0 %2919 }
 0x998   :  { %v2481_v24 = vpop.f32.mrb[24].mxu0 }
 0x999   :  { %2951 = vrot.lane.b32.xlu0 %v2481_v24, %s4017_s21  ;;  %v3708_v25 = vpop.f32.mrb[25].mxu0  ;;  %v2928_v24 = vpop.permute.xlu0 %2927 }
 0x99a   :  { %v2930_v25 = vpop.permute.xlu1 %2929 }
 0x99c   :  { %v2557_v26 = vpop.f32.mrb[30].mxu1  ;;  %v2635_v27 = vpop.f32.mrb[26].mxu0 }
 0x99d   :  { %v2717_v28 = vmul.f32 0.5, %v2635_v27  ;;  %2953 = vrot.lane.b32.xlu1 %v2557_v26, %s4017_s21  ;;  %v3713_v29 = vpop.f32.mrb[31].mxu1  ;;  %v3718_v30 = vpop.f32.mrb[27].mxu0 }
 0x99e   :  { %v2936_v26 = vpop.permute.xlu0 %2935  ;;  %v2938_v27 = vpop.permute.xlu1 %2937  ;;  %v2965_v29 = vsel %vm128_vm2, %v4181_v4, %v2912_v20 }
 0x99f   :  { %v2719_v31 = vsel %vm282_vm3, %v2717_v28, -inf  ;;  %v2967_v30 = vsel %vm282_vm3, %v2965_v29, %v2920_v22 }
 0x9a0   :  { %v2720_v32 = vrot.slane %v2719_v31, 4  ;;  %v2713_v33 = vpop.f32.mrb[32].mxu1 }
 0x9a1   :  { %v2718_v34 = vmul.f32 0.5, %v2713_v33  ;;  %v3723_v35 = vpop.f32.mrb[33].mxu1  ;;  %v2970_v33 = vsel %vm2969_vm4, %v2967_v30, %v2928_v24  ;;  %v3232_v30 = vld [vmem:[%s4475_s6 + $0x10] sm:$0xff] }
 0x9a2   :  { %v2721_v36 = vmax.f32 %v2719_v31, %v2720_v32  ;;  %v2946_v31 = vpop.permute.xlu1 %2945  ;;  %v2966_v35 = vsel %vm128_vm2, %v4183_v6, %v2914_v21  ;;  %v3452_v6 = vld [vmem:[%s4476_s7] ss:$0 sm:$0xff]  ;;  %v3455_v21 = vld [vmem:[%s4476_s7 + $0x1] ss:$0 sm:$0xff] }
 0x9a3   :  { %v2726_v37 = vsel %vm282_vm3, %v2718_v34, -inf }
 0x9a4   :  { %v2722_v8 = vrot.slane %v2721_v36, 2  ;;  %v2727_v38 = vrot.slane %v2726_v37, 4 }
 0x9a6   :  { %v2723_v39 = vmax.f32 %v2721_v36, %v2722_v8  ;;  %v2728_v40 = vmax.f32 %v2726_v37, %v2727_v38  ;;  %v2968_v37 = vsel %vm282_vm3, %v2966_v35, %v2922_v23  ;;  %v3456_v23 = vld [vmem:[%s4476_s7 + $0x2] ss:$0 sm:$0xff] }
 0x9a8   :  { %v2724_v41 = vrot.slane %v2723_v39, 1  ;;  %v2729_v42 = vrot.slane %v2728_v40, 2 }
 0x9aa   :  { %v2725_v43 = vmax.f32 %v2723_v39, %v2724_v41  ;;  %v2730_v44 = vmax.f32 %v2728_v40, %v2729_v42  ;;  %v2971_v39 = vsel %vm2969_vm4, %v2968_v37, %v2930_v25  ;;  %v3237_v37 = vld [vmem:[%s4475_s6 + $0x38] sm:$0xff] }
 0x9ab   :  { %v2974_v41 = vsel %vm2972_vm5, %v2971_v39, %v2938_v27 }
 0x9ac   :  { %v2733_v45 = vsub.f32 %v2717_v28, %v2725_v43  ;;  %v2731_v46 = vrot.slane %v2730_v44, 1  ;;  %v2944_v28 = vpop.permute.xlu0 %2943  ;;  %v2977_v42 = vsel %vm2975_vm6, %v2974_v41, %v2946_v31  ;;  %v3233_v31 = vld [vmem:[%s4475_s6 + $0x18] sm:$0xff] }
 0x9ad   :  { %v3241_v41 = vld [vmem:[%s4475_s6 + $0x58] sm:$0xff] }
 0x9ae   :  { %v2735_v47 = vmul.f32 1.442695, %v2733_v45  ;;  %v2732_v48 = vmax.f32 %v2730_v44, %v2731_v46 }
 0x9b0   :  { %3937 = vpow2.f32 %v2735_v47  ;;  %v2734_v49 = vsub.f32 %v2718_v34, %v2732_v48  ;;  %v2973_v34 = vsel %vm2972_vm5, %v2970_v33, %v2936_v26  ;;  %v3234_v33 = vld [vmem:[%s4475_s6 + $0x20] sm:$0xff] }
 0x9b1   :  { %v2976_v36 = vsel %vm2975_vm6, %v2973_v34, %v2944_v28  ;;  %v3235_v34 = vld [vmem:[%s4475_s6 + $0x28] sm:$0xff] }
 0x9b2   :  { %v2737_v50 = vmul.f32 1.442695, %v2734_v49  ;;  %v3823_v35 = vpack.c.bf16 %v3235_v34, %v3234_v33 }
 0x9b4   :  { %3939 = vpow2.f32 %v2737_v50  ;;  %v3961_v50 = vld [vmem:[%s4469_s0 + $0x8] sm:$0xff] }
 0x9ba   :  { %v3938_v51 = vpop.eup %3937 }
 0x9bb   :  { %v2739_v52 = vsel %vm282_vm3, %v3938_v51, 0.0 }
 0x9bc   :  { %v2740_v53 = vrot.slane %v2739_v52, 4 }
 0x9be   :  { %v3940_v54 = vpop.eup %3939  ;;  %v2741_v55 = vadd.f32 %v2740_v53, %v2739_v52  ;;  %v3962_v52 = vld [vmem:[%s4469_s0] sm:$0xff]  ;;  %s3963_s0 = scalar_lea.vmem %s3391_s13, 256 }
 0x9bf   :  { %v2746_v56 = vsel %vm282_vm3, %v3940_v54, 0.0  ;;  %p3964_p0 = scmp.ne.s32.totalorder %s3391_s13, %s3963_s0  ;;  %p3969_p2 = scmp.lt.s32.totalorder %s3963_s0, %s3963_s0 }
 0x9c0   :  { %v2742_v57 = vrot.slane %v2741_v55, 2  ;;  %v2747_v58 = vrot.slane %v2746_v56, 4 }
 0x9c1   :  { %p3970_p3 = por %p3969_p2, %p3968_p1 }
 0x9c2   :  { %v2743_v59 = vadd.f32 %v2742_v57, %v2741_v55  ;;  %v2748_v60 = vadd.f32 %v2747_v58, %v2746_v56 }
 0x9c3   :  { %p3971_p4 = pnand %p3970_p3, %p3964_p0 }
 0x9c4   :  { %v2744_v61 = vrot.slane %v2743_v59, 1  ;;  %v2749_v62 = vrot.slane %v2748_v60, 2 }
 0x9c6   :  { %v2745_v63 = vadd.f32 %v2744_v61, %v2743_v59  ;;  %v2750_v0 = vadd.f32 %v2749_v62, %v2748_v60 }
 0x9c8   :  { %3941 = vrcp.f32 %v2745_v63  ;;  %v2751_v1 = vrot.slane %v2750_v0, 1 }
 0x9ca   :  { %v2752_v2 = vadd.f32 %v2751_v1, %v2750_v0 }
 0x9cc   :  { %3943 = vrcp.f32 %v2752_v2  ;;  %v3120_v2 = vld [vmem:[%s4473_s4] sm:$0xff] }
 0x9d2   :  { %v3942_v3 = vpop.eup %3941 }
 0x9d3   :  { %v2755_v5 = vmul.f32 %v3942_v3, %v3938_v51  ;;  %v3121_v3 = vld [vmem:[%s4473_s4 + $0x8] sm:$0xff] }
 0x9d5   :  { %3727 = vmatmul.mubr.msk.f32.vlgmr.msra.gmra.mrb[28].mxu0 %vm282_vm3, %v2755_v5  ;;  %v3807_v5 = vpack.c.bf16 %v3121_v3, %v3120_v2 }
 0x9d6   :  { %v3944_v7 = vpop.eup %3943 }
 0x9d7   :  { %v2756_v9 = vmul.f32 %v3944_v7, %v3940_v54  ;;  %v3122_v7 = vld [vmem:[%s4473_s4 + $0x10] sm:$0xff] }
 0x9d9   :  { %3732 = vmatmul.mubr.msk.f32.vlgmr.msra.gmra.mrb[34].mxu1 %vm282_vm3, %v2756_v9  ;;  %v3123_v9 = vld [vmem:[%s4473_s4 + $0x18] sm:$0xff] }
 0x9da   :  { %3802 = vmatpush3.bf16.msra.mxu1 %v3799_v12  ;;  %v3811_v10 = vpack.c.bf16 %v3123_v9, %v3122_v7  ;;  %v3231_v12 = vld [vmem:[%s4475_s6 + $0x8] sm:$0xff] }
 0x9db   :  { %3804 = vmatprep.subr.bf16.mxu1 %v3803_v15  ;;  %v3815_v13 = vpack.c.bf16 %v3231_v12, %v3230_v11 }
 0x9dd   :  { %3816 = vmatprep.subr.bf16.mxu0 %v3815_v13 }
 0x9de   :  { %3806 = vmatpush3.bf16.msra.mxu1 %v3803_v15  ;;  %3818 = vmatpush3.bf16.msra.mxu0 %v3815_v13 }
 0x9df   :  { %3808 = vmatprep.subr.bf16.mxu1 %v3807_v5 }
 0xa0b   :  { %v2952_v32 = vpop.permute.xlu0 %2951 }
 0xa0c   :  { %v2979_v4 = vsel %vm2978_vm7, %v2976_v36, %v2952_v32  ;;  %v3819_v32 = vpack.c.bf16 %v3233_v31, %v3232_v30  ;;  %v3236_v36 = vld [vmem:[%s4475_s6 + $0x30] sm:$0xff] }
 0xa0e   :  { %3820 = vmatprep.subr.bf16.mxu0 %v3819_v32 }
 0xa0f   :  { %v2954_v8 = vpop.permute.xlu1 %2953  ;;  %3822 = vmatpush3.bf16.msra.mxu0 %v3819_v32 }
 0xa10   :  { %v2980_v43 = vsel %vm2978_vm7, %v2977_v42, %v2954_v8  ;;  %3824 = vmatprep.subr.bf16.mxu0 %v3823_v35  ;;  %v3238_v8 = vld [vmem:[%s4475_s6 + $0x40] sm:$0xff] }
 0xa13   :  { %3826 = vmatpush3.bf16.msra.mxu0 %v3823_v35 }
 0xaa8   :  { %v2829_v16 = vpop.f32.mrb[28].mxu0 }
 0xaa9   :  { %2959 = vrot.lane.b32.xlu0 %v2829_v16, %s4018_s30  ;;  %v3728_v17 = vpop.f32.mrb[29].mxu0 }
 0xaac   :  { %v2905_v18 = vpop.f32.mrb[34].mxu1 }
 0xaad   :  { %2961 = vrot.lane.b32.xlu1 %v2905_v18, %s4018_s30  ;;  %v3733_v19 = vpop.f32.mrb[35].mxu1 }
 0xb1b   :  { %v2960_v38 = vpop.permute.xlu0 %2959 }
 0xb1c   :  { %v2982_v40 = vsel %vm2981_vm8, %v2979_v4, %v2960_v38  ;;  %v3827_v4 = vpack.c.bf16 %v3237_v37, %v3236_v36  ;;  %v3239_v38 = vld [vmem:[%s4475_s6 + $0x48] sm:$0xff] }
 0xb1d   :  { %3742 = vmatprep.mubr.msk.f32.mxu1 %vm43_vm0, %v2982_v40  ;;  %v3831_v39 = vpack.c.bf16 %v3239_v38, %v3238_v8  ;;  %v3240_v40 = vld [vmem:[%s4475_s6 + $0x50] sm:$0xff] }
 0xb1e   :  { %3828 = vmatprep.subr.bf16.mxu0 %v3827_v4  ;;  %v3835_v42 = vpack.c.bf16 %v3241_v41, %v3240_v40 }
 0xb1f   :  { %v2962_v44 = vpop.permute.xlu1 %2961  ;;  %3830 = vmatpush3.bf16.msra.mxu0 %v3827_v4 }
 0xb20   :  { %v2983_v45 = vsel %vm2981_vm8, %v2980_v43, %v2962_v44  ;;  %3832 = vmatprep.subr.bf16.mxu0 %v3831_v39  ;;  %v3242_v43 = vld [vmem:[%s4475_s6 + $0x60] sm:$0xff]  ;;  %v3243_v44 = vld [vmem:[%s4475_s6 + $0x68] sm:$0xff] }
 0xb21   :  { %3743 = vmatmul.mubr.msk.f32.vlgmr.msra.gmra.mrb[36].mxu1 %vm43_vm0, %v2983_v45  ;;  %v3839_v45 = vpack.c.bf16 %v3243_v44, %v3242_v43 }
 0xb22   :  { %3810 = vmatpush3.bf16.msra.mxu1 %v3807_v5 }
 0xb23   :  { %3812 = vmatprep.subr.bf16.mxu1 %v3811_v10  ;;  %3834 = vmatpush3.bf16.msra.mxu0 %v3831_v39 }
 0xb24   :  { %3836 = vmatprep.subr.bf16.mxu0 %v3835_v42 }
 0xb26   :  { %3814 = vmatpush3.bf16.msra.mxu1 %v3811_v10  ;;  %v3460_v10 = vld [vmem:[%s4476_s7 + $0x3] ss:$0 sm:$0xff] }
 0xb27   :  { %3838 = vmatpush3.bf16.msra.mxu0 %v3835_v42 }
 0xb28   :  { %3840 = vmatprep.subr.bf16.mxu0 %v3839_v45 }
 0xb2b   :  { %3842 = vmatpush3.bf16.msra.mxu0 %v3839_v45 }
 0xbf4   :  { %v3744_v46 = vpop.f32.mrb[36].mxu1 }
 0xbf5   :  { %v3076_v47 = vadd.f32 %v3744_v46, %v3452_v6  ;;  %v3070_v48 = vpop.f32.mrb[37].mxu1  ;;  %v3245_v46 = vld [vmem:[%s4475_s6 + $0x78] sm:$0xff] }
 0xbf6   :  { %v3071_v49 = vadd.f32 %v3452_v6, %v3070_v48  ;;  %v3244_v6 = vld [vmem:[%s4475_s6 + $0x70] sm:$0xff]  ;;  %v3457_v48 = vld [vmem:[%s4474_s5] ss:$0 sm:$0xff] }
 0xbf7   :  { %v3080_v51 = vadd.f32 %v3961_v50, %v3076_v47  ;;  %v3843_v47 = vpack.c.bf16 %v3245_v46, %v3244_v6 }
 0xbf8   :  { %v3079_v53 = vadd.f32 %v3962_v52, %v3071_v49 }
 0xbf9   :  { %v3084_v54 = vsel %vm43_vm0, %v3080_v51, 0.0  ;;  %3844 = vmatprep.subr.bf16.mxu0 %v3843_v47 }
 0xbfa   :  { %3085 = vadd.xlane.f32.xlu1 %v3084_v54  ;;  %v3081_v55 = vsel %vm43_vm0, %v3079_v53, 0.0  ;;  %3846 = vmatpush3.bf16.msra.mxu0 %v3843_v47 }
 0xbfb   :  { %3082 = vadd.xlane.f32.xlu0 %v3081_v55 }
 0xc87   :  { %v3086_v56 = vpop.xlane.xlu1 %3085 }
 0xc88   :  { %v3089_v57 = vmul.f32 0.03125, %v3086_v56  ;;  %v3083_v58 = vpop.xlane.xlu0 %3082 }
 0xc89   :  { %v3088_v59 = vmul.f32 0.03125, %v3083_v58 }
 0xc8a   :  { %v3091_v60 = vsub.f32 %v3080_v51, %v3089_v57 }
 0xc8b   :  { %v3090_v61 = vsub.f32 %v3079_v53, %v3088_v59 }
 0xc8c   :  { %v3093_v0 = vmul.f32 %v3091_v60, %v3091_v60 }
 0xc8d   :  { %v3092_v62 = vmul.f32 %v3090_v61, %v3090_v61 }
 0xc8e   :  { %v3097_v1 = vsel %vm43_vm0, %v3093_v0, 0.0 }
 0xc8f   :  { %v3094_v63 = vsel %vm43_vm0, %v3092_v62, 0.0 }
 0xc90   :  { %3095 = vadd.xlane.f32.xlu0 %v3094_v63 }
 0xc94   :  { %3098 = vadd.xlane.f32.xlu0 %v3097_v1 }
 0xd1d   :  { %v3096_v14 = vpop.xlane.xlu0 %3095 }
 0xd1e   :  { %v3100_v15 = vmul.f32 0.03125, %v3096_v14 }
 0xd20   :  { %v3102_v16 = vadd.f32 1e-05, %v3100_v15 }
 0xd21   :  { %v3099_v17 = vpop.xlane.xlu0 %3098 }
 0xd22   :  { %3945 = vrsqrt.f32 %v3102_v16  ;;  %v3101_v18 = vmul.f32 0.03125, %v3099_v17 }
 0xd24   :  { %v3103_v19 = vadd.f32 1e-05, %v3101_v18 }
 0xd26   :  { %3947 = vrsqrt.f32 %v3103_v19 }
 0xd2c   :  { %v3946_v20 = vpop.eup %3945 }
 0xd2d   :  { %v3106_v22 = vmul.f32 %v3946_v20, %v3090_v61 }
 0xd2f   :  { %v3112_v24 = vmul.f32 %v3455_v21, %v3106_v22 }
 0xd30   :  { %v3948_v25 = vpop.eup %3947 }
 0xd31   :  { %v3107_v26 = vmul.f32 %v3948_v25, %v3091_v60  ;;  %v4386_v27 = vadd.f32 %v3456_v23, %v3112_v24 }
 0xd33   :  { %v3113_v28 = vmul.f32 %v3455_v21, %v3107_v26  ;;  %3753 = vmatprep.mubr.msk.f32.mxu1 %vm43_vm0, %v4386_v27 }
 0xd35   :  { %v4390_v29 = vadd.f32 %v3456_v23, %v3113_v28 }
 0xd37   :  { %3754 = vmatmul.mubr.msk.f32.vlgmr.msra.gmra.mrb[38].mxu1 %vm43_vm0, %v4390_v29 }
 0xe0a   :  { %v3755_v49 = vpop.f32.mrb[38].mxu1 }
 0xe0b   :  { %v3209_v50 = vadd.f32 %v3755_v49, %v3457_v48  ;;  %v3203_v51 = vpop.f32.mrb[39].mxu1 }
 0xe0c   :  { %v3204_v52 = vadd.f32 %v3457_v48, %v3203_v51  ;;  %v3461_v51 = vld [vmem:[%s4476_s7 + $0x4] ss:$0 sm:$0xff] }
 0xe0d   :  { %v3215_v53 = vmul.f32 0.044715, %v3209_v50  ;;  %v3213_v5 = vmul.f32 0.5, %v3209_v50 }
 0xe0e   :  { %v3214_v54 = vmul.f32 0.044715, %v3204_v52  ;;  %v3212_v2 = vmul.f32 0.5, %v3204_v52 }
 0xe0f   :  { %v3217_v55 = vmul.f32 %v3215_v53, %v3209_v50 }
 0xe10   :  { %v3216_v56 = vmul.f32 %v3214_v54, %v3204_v52 }
 0xe11   :  { %v3219_v57 = vmul.f32 %v3217_v55, %v3209_v50  ;;  %v3462_v55 = vld [vmem:[%s4476_s7 + $0x5] ss:$0 sm:$0xff] }
 0xe12   :  { %v3218_v58 = vmul.f32 %v3216_v56, %v3204_v52 }
 0xe13   :  { %v3221_v59 = vadd.f32 %v3219_v57, %v3209_v50 }
 0xe14   :  { %v3220_v60 = vadd.f32 %v3218_v58, %v3204_v52 }
 0xe15   :  { %v3223_v61 = vmul.f32 0.7978846, %v3221_v59 }
 0xe16   :  { %v3222_v62 = vmul.f32 0.7978846, %v3220_v60 }
 0xe17   :  { %3949 = vtanh.f32 %v3223_v61 }
 0xe18   :  { %3951 = vtanh.f32 %v3222_v62 }
 0xe21   :  { %v3950_v63 = vpop.eup %3949 }
 0xe22   :  { %v3952_v0 = vpop.eup %3951  ;;  %v3227_v1 = vadd.f32 1.0, %v3950_v63 }
 0xe23   :  { %v3226_v3 = vadd.f32 1.0, %v3952_v0 }
 0xe24   :  { %v3229_v9 = vmul.f32 %v3227_v1, %v3213_v5 }
 0xe25   :  { %v3228_v7 = vmul.f32 %v3226_v3, %v3212_v2 }
 0xe27   :  { %3788 = vmatprep.mubr.f32.mxu0 %v3228_v7 }
 0xe28   :  { %3789 = vmatmul.mubr.f32.vlgmr.msra.gmra.mrb[30].mxu0 %v3229_v9 }
 0xefb   :  { %v3790_v11 = vpop.f32.mrb[30].mxu0 }
 0xefc   :  { %v3322_v12 = vadd.f32 %v3790_v11, %v3460_v10  ;;  %v3316_v13 = vpop.f32.mrb[31].mxu0 }
 0xefd   :  { %v3317_v14 = vadd.f32 %v3460_v10, %v3316_v13 }
 0xefe   :  { %v3328_v15 = vmul.f32 0.044715, %v3322_v12  ;;  %v3326_v28 = vmul.f32 0.5, %v3322_v12 }
 0xeff   :  { %v3327_v16 = vmul.f32 0.044715, %v3317_v14  ;;  %v3325_v31 = vmul.f32 0.5, %v3317_v14 }
 0xf00   :  { %v3330_v17 = vmul.f32 %v3328_v15, %v3322_v12 }
 0xf01   :  { %v3329_v18 = vmul.f32 %v3327_v16, %v3317_v14 }
 0xf02   :  { %v3332_v19 = vmul.f32 %v3330_v17, %v3322_v12 }
 0xf03   :  { %v3331_v20 = vmul.f32 %v3329_v18, %v3317_v14 }
 0xf04   :  { %v3334_v21 = vadd.f32 %v3332_v19, %v3322_v12 }
 0xf05   :  { %v3333_v22 = vadd.f32 %v3331_v20, %v3317_v14 }
 0xf06   :  { %v3336_v23 = vmul.f32 0.7978846, %v3334_v21 }
 0xf07   :  { %v3335_v24 = vmul.f32 0.7978846, %v3333_v22 }
 0xf08   :  { %3953 = vtanh.f32 %v3336_v23 }
 0xf09   :  { %3955 = vtanh.f32 %v3335_v24 }
 0xf12   :  { %v3954_v25 = vpop.eup %3953 }
 0xf13   :  { %v3956_v26 = vpop.eup %3955  ;;  %v3340_v30 = vadd.f32 1.0, %v3954_v25 }
 0xf14   :  { %v3339_v32 = vadd.f32 1.0, %v3956_v26 }
 0xf15   :  { %v3342_v33 = vmul.f32 %v3340_v30, %v3326_v28 }
 0xf16   :  { %v3341_v34 = vmul.f32 %v3339_v32, %v3325_v31 }
 0xf17   :  { %v3344_v35 = vadd.f32 %v3342_v33, %v4390_v29 }
 0xf18   :  { %v3343_v36 = vadd.f32 %v3341_v34, %v4386_v27 }
 0xf19   :  { %v3348_v37 = vsel %vm43_vm0, %v3344_v35, 0.0 }
 0xf1a   :  { %3349 = vadd.xlane.f32.xlu0 %v3348_v37  ;;  %v3345_v4 = vsel %vm43_vm0, %v3343_v36, 0.0 }
 0xf1b   :  { %3346 = vadd.xlane.f32.xlu1 %v3345_v4 }
 0xfa7   :  { %v3350_v8 = vpop.xlane.xlu0 %3349 }
 0xfa8   :  { %v3352_v38 = vmul.f32 0.03125, %v3350_v8  ;;  %v3347_v39 = vpop.xlane.xlu1 %3346 }
 0xfa9   :  { %v3351_v40 = vmul.f32 0.03125, %v3347_v39 }
 0xfaa   :  { %v3354_v41 = vsub.f32 %v3344_v35, %v3352_v38 }
 0xfab   :  { %v3353_v42 = vsub.f32 %v3343_v36, %v3351_v40 }
 0xfac   :  { %v3356_v43 = vmul.f32 %v3354_v41, %v3354_v41 }
 0xfad   :  { %v3355_v44 = vmul.f32 %v3353_v42, %v3353_v42 }
 0xfae   :  { %v3360_v45 = vsel %vm43_vm0, %v3356_v43, 0.0 }
 0xfaf   :  { %3361 = vadd.xlane.f32.xlu0 %v3360_v45  ;;  %v3357_v29 = vsel %vm43_vm0, %v3355_v44, 0.0 }
 0xfb0   :  { %3358 = vadd.xlane.f32.xlu1 %v3357_v29 }
0x103c   :  { %v3362_v27 = vpop.xlane.xlu0 %3361 }
0x103d   :  { %v3364_v6 = vmul.f32 0.03125, %v3362_v27  ;;  %v3359_v46 = vpop.xlane.xlu1 %3358 }
0x103e   :  { %v3363_v47 = vmul.f32 0.03125, %v3359_v46 }
0x103f   :  { %v3366_v48 = vadd.f32 1e-05, %v3364_v6 }
0x1040   :  { %v3365_v49 = vadd.f32 1e-05, %v3363_v47 }
0x1041   :  { %3957 = vrsqrt.f32 %v3366_v48 }
0x1042   :  { %3959 = vrsqrt.f32 %v3365_v49 }
0x104b   :  { %v3958_v50 = vpop.eup %3957 }
0x104c   :  { %v3960_v52 = vpop.eup %3959  ;;  %v3370_v53 = vmul.f32 %v3958_v50, %v3354_v41 }
0x104d   :  { %v3369_v54 = vmul.f32 %v3960_v52, %v3353_v42 }
0x104e   :  { %v3376_v56 = vmul.f32 %v3461_v51, %v3370_v53 }
0x104f   :  { %v3375_v57 = vmul.f32 %v3461_v51, %v3369_v54 }
0x1050   :  { %v3382_v58 = vadd.f32 %v3462_v55, %v3376_v56 }
0x1051   :  { %v3381_v59 = vadd.f32 %v3462_v55, %v3375_v57 }
0x1052   :  { %3384 = vst.msk [vmem:[#allocation2 + $0x8] sm:$0xff] %vm43_vm0, %v3382_v58 }
0x1053   :  { %3383 = vst.msk [vmem:[#allocation2] sm:$0xff] %vm43_vm0, %v3381_v59 }
0x1054   :  { %3974 = shalt.err (!%p3971_p4)
}
0x1055   :  { %s3975_s15 = scalar_lea.hbm %s4477_s8, 256 }
0x1056   :  { %p3976_p5 = scmp.ne.s32.totalorder %s4477_s8, %s3975_s15  ;;  %p3979_p6 = scmp.lt.u32.totalorder %s3975_s15, %s4477_s8 }
0x1058   :  { %p3981_p7 = pnand %p3979_p6, %p3976_p5 }
0x105a   :  { %3984 = shalt.err (!%p3981_p7)
}
0x105b   :  { %s4020_s20 = smov 128  }
0x105c   :  { %3396 = dma.vmem_to_hbm [thread:$0]  %s3391_s13, 256, %s4477_s8, [#allocation3], %s4020_s20, %s4020_s20, %s4013_s18  }
0x105d   :  { %3985 = dma.done.wait [#allocation3], 256  }
0x105e   :  { %3986 = vsyncadd [#allocation3], 4294967040 }
0x105f   :  { %3400 = vsyncpa [#allocation3], 1 }

</bundles_post_ra>
